<compile_context>
chip_gen: v6e
topology: v6e:2x2x1
jax: 0.10.0
libtpu: 0.0.40
codegen_flags: <defaults>
</compile_context>

<pallas_src>
import functools
import math

import jax
import jax.numpy as jnp
from jax.experimental import pallas as pl
from jax.experimental.pallas import tpu as pltpu


def deepsets_kernel(x_ref,
                    w1_ref, b1_ref, w2_ref, b2_ref, w3_ref, b3_ref,
                    lg1_ref, d1_ref, lg2_ref, d2_ref,
                    out_ref, *, n, l):
    m, _ = x_ref.shape                 # m = bt * n * l  (static per block)
    bt = m // (n * l)
    pts = x_ref[...]                   # (M, 3) f32 -- already row-flat, no reshape

    # --- Conv1dBlock([3, 64, 256, 128]) with kernel_size=1 == per-point MLP ---
    # Layer 1 (K=3): VPU multiply-adds (keeps the lane-sparse K off the MXU).
    w1 = w1_ref[...]
    h = (pts[:, 0:1] * w1[0:1, :]
         + pts[:, 1:2] * w1[1:2, :]
         + pts[:, 2:3] * w1[2:3, :]
         + b1_ref[...])
    h = jnp.maximum(h, 0.0)                                       # (M, 64) f32

    # Layers 2 & 3: bf16 MXU inputs, f32 accumulation.
    h = jnp.maximum(
        jnp.dot(h.astype(jnp.bfloat16), w2_ref[...],
                preferred_element_type=jnp.float32) + b2_ref[...], 0.0)   # (M, 256)
    h = jnp.maximum(
        jnp.dot(h.astype(jnp.bfloat16), w3_ref[...],
                preferred_element_type=jnp.float32) + b3_ref[...], 0.0)   # (M, 128)

    # torch.max(x, 2)[0]: max over the length axis, per (batch, set element).
    feat = jnp.max(h.reshape(bt, n, l, 128), axis=2)              # (BT, N, 128)

    # --- DeepSetsBlock (128, 128, 1): Lambda/Gamma fused into one matmul ---
    p = jnp.dot(feat.reshape(bt * n, 128).astype(jnp.bfloat16), lg1_ref[...],
                preferred_element_type=jnp.float32).reshape(bt, n, 256)
    h1 = jnp.maximum(
        p[:, :, :128]
        + jnp.mean(p[:, :, 128:], axis=1, keepdims=True)          # per-batch set mean
        + d1_ref[...], 0.0)                                       # (BT, N, 128)

    # Final layer also in bf16 (f32 acc) -- it otherwise dominates MXU pushes.
    q = jnp.dot(h1.reshape(bt * n, 128).astype(jnp.bfloat16), lg2_ref[...],
                preferred_element_type=jnp.float32).reshape(bt, n, 2)
    s = (q[:, :, 0]
         + jnp.mean(q[:, :, 1], axis=1, keepdims=True)            # per-batch set mean
         + d2_ref[...])                                           # (BT, N)

    # F.log_softmax over the set dimension (dim=1), per batch.
    z = s - jnp.max(s, axis=1, keepdims=True)
    lsm = z - jnp.log(jnp.sum(jnp.exp(z), axis=1, keepdims=True))

    # Single lane-dense store per grid step.
    out_ref[...] = lsm.reshape(1, bt * n)


def _tpu_tuning():
    """Per-generation tiling budget: (#TensorCores, row budget, VMEM limit)."""
    kind = ""
    try:
        kind = jax.devices()[0].device_kind.lower()
    except Exception:
        pass
    if "v5e" in kind or "v5 lite" in kind or "v5lite" in kind:
        # v5e: 1 TC, 128 MiB physical VMEM (scoped default only 16 MiB).
        return {"num_tc": 1, "max_rows": 12288, "vmem_limit": 64 << 20}
    if "v6" in kind:
        # v6e: 1 TC, 128 MiB physical VMEM -- one big block, MXU-bound.
        return {"num_tc": 1, "max_rows": 16384, "vmem_limit": 80 << 20}
    if "v7" in kind or "7x" in kind:
        # v7x: 2 TCs, only 64 MiB physical VMEM.
        return {"num_tc": 2, "max_rows": 8192, "vmem_limit": 48 << 20}
    # Unknown chip: stay within the default scoped-VMEM limit, no override.
    return {"num_tc": 1, "max_rows": 4096, "vmem_limit": None}


def _choose_batch_tile(b, n, l, *, num_tc, max_rows):
    """Batches per grid step.

    * No divisibility requirement on B: the grid uses cdiv; the ragged tail
      block's padded batches never mix with valid rows (all reductions are per
      batch row) and are sliced off in the wrapper.
    * Single maximal block on single-TC chips (the grid is a serial loop there).
    * On 2-TC chips keep >= num_tc grid steps and prefer an even grid count.
    * Keep rows-per-block a multiple of 8 (sublane tile) when tiling.
    """
    rows_per_batch = max(1, n * l)
    bt = max(1, min(b, max_rows // rows_per_batch))          # VMEM row budget
    if num_tc > 1 and b > 1:
        bt = min(bt, (b + num_tc - 1) // num_tc)             # give every TC work
    if bt >= b:
        return b                                             # one full block

    align = 8 // math.gcd(8, rows_per_batch)                 # rows % 8 == 0
    if (bt // align) * align >= 1:
        bt = (bt // align) * align

    if num_tc > 1:
        g = -(-b // bt)
        if g % num_tc:                                       # even out last wave
            g += num_tc - (g % num_tc)
            new_bt = -(-b // g)
            if (new_bt // align) * align >= 1:
                new_bt = (new_bt // align) * align
            bt = max(1, new_bt)
    return min(bt, b)


def _full_spec(a):
    return pl.BlockSpec(a.shape, lambda i, _nd=a.ndim: (0,) * _nd)


def deepsets_forward(x_bnlc, params, *, batch_tile=None):
    """x_bnlc: (B, N, L, 3) float32  ->  (B, N) log-probabilities over the set."""
    b, n, l, c = x_bnlc.shape
    (w1, b1, w2, b2, w3, b3, l1, g1, d1, l2, g2, d2) = params

    # Fuse Lambda/Gamma (exact by linearity: mean(x) @ G == mean(x @ G)).
    lg1 = jnp.concatenate([l1, g1], axis=1)                  # (128, 256)
    lg2 = jnp.concatenate([l2, g2], axis=1)                  # (128, 2)

    kparams = (
        w1.astype(jnp.float32),  b1.astype(jnp.float32),
        w2.astype(jnp.bfloat16), b2.astype(jnp.float32),
        w3.astype(jnp.bfloat16), b3.astype(jnp.float32),
        lg1.astype(jnp.bfloat16), d1.astype(jnp.float32),
        lg2.astype(jnp.bfloat16), d2.astype(jnp.float32),
    )

    tune = _tpu_tuning()
    if batch_tile is None:
        bt = _choose_batch_tile(b, n, l, num_tc=tune["num_tc"],
                                max_rows=tune["max_rows"])
    else:
        bt = max(1, min(int(batch_tile), b))
    g = pl.cdiv(b, bt)
    rows_blk = bt * n * l

    # Wrapper-side flatten: one-time HBM layout plumbing, keeps the kernel free
    # of relayouts of the lane-padded input for arbitrary L.
    x_rows = x_bnlc.reshape(b * n * l, c)

    grid_spec = pltpu.PrefetchScalarGridSpec(
        num_scalar_prefetch=0,
        grid=(g,),
        in_specs=[pl.BlockSpec((rows_blk, c), lambda i: (i, 0))]
                 + [_full_spec(p) for p in kparams],
        out_specs=pl.BlockSpec((1, bt * n), lambda i: (i, 0)),
    )

    cp_kwargs = dict(dimension_semantics=("parallel",))
    if tune["vmem_limit"] is not None:
        cp_kwargs["vmem_limit_bytes"] = tune["vmem_limit"]

    out = pl.pallas_call(
        functools.partial(deepsets_kernel, n=n, l=l),
        out_shape=jax.ShapeDtypeStruct((g, bt * n), jnp.float32),
        grid_spec=grid_spec,
        compiler_params=pltpu.CompilerParams(**cp_kwargs),
    )(x_rows, *kparams)

    # Drop ragged-tail padding batches (if B % BT != 0).
    return out.reshape(g * bt, n)[:b]


def reference_forward_f32(x_bnlc, params):
    """Pure fp32 reference with the module's exact semantics."""
    (w1, b1, w2, b2, w3, b3, l1, g1, d1, l2, g2, d2) = params
    b, n, l, c = x_bnlc.shape
    pts = x_bnlc.reshape(b, n * l, c)
    h = jax.nn.relu(pts @ w1 + b1)
    h = jax.nn.relu(h @ w2 + b2)
    h = jax.nn.relu(h @ w3 + b3)
    feat = jnp.max(h.reshape(b, n, l, 128), axis=2)          # (B, N, 128)
    m0 = jnp.mean(feat, axis=1, keepdims=True)
    h1 = jax.nn.relu(feat @ l1 + m0 @ g1 + d1)
    m1 = jnp.mean(h1, axis=1, keepdims=True)
    s = (h1 @ l2 + m1 @ g2 + d2)[..., 0]                     # (B, N)
    return jax.nn.log_softmax(s, axis=1)


def reference_forward_matched(x_bnlc, params):
    """Reference mirroring the kernel's mixed precision (bf16 MXU inputs, f32
    accumulation) and fused Lambda/Gamma, for a tight apples-to-apples check."""
    (w1, b1, w2, b2, w3, b3, l1, g1, d1, l2, g2, d2) = params
    b, n, l, c = x_bnlc.shape
    lg1 = jnp.concatenate([l1, g1], axis=1).astype(jnp.bfloat16)
    lg2 = jnp.concatenate([l2, g2], axis=1).astype(jnp.bfloat16)
    pts = x_bnlc.reshape(b, n * l, c)
    h = jax.nn.relu(pts[..., 0:1] * w1[0:1, :]
                    + pts[..., 1:2] * w1[1:2, :]
                    + pts[..., 2:3] * w1[2:3, :] + b1)
    h = jax.nn.relu(
        jnp.einsum('bmk,kf->bmf', h.astype(jnp.bfloat16), w2.astype(jnp.bfloat16),
                   preferred_element_type=jnp.float32) + b2)
    h = jax.nn.relu(
        jnp.einsum('bmk,kf->bmf', h.astype(jnp.bfloat16), w3.astype(jnp.bfloat16),
                   preferred_element_type=jnp.float32) + b3)
    feat = jnp.max(h.reshape(b, n, l, 128), axis=2)
    p = jnp.einsum('bnk,kf->bnf', feat.astype(jnp.bfloat16), lg1,
                   preferred_element_type=jnp.float32)
    h1 = jax.nn.relu(p[..., :128] + jnp.mean(p[..., 128:], axis=1, keepdims=True) + d1)
    q = jnp.einsum('bnk,kf->bnf', h1.astype(jnp.bfloat16), lg2,
                   preferred_element_type=jnp.float32)
    s = q[..., 0] + jnp.mean(q[..., 1], axis=1, keepdims=True) + d2[0, 0]
    return jax.nn.log_softmax(s, axis=1)


def init_params(key):
    ks = jax.random.split(key, 10)

    def dense(k, fan_in, fan_out):
        return (jax.random.normal(k, (fan_in, fan_out), jnp.float32)
                / jnp.sqrt(jnp.float32(fan_in)))

    w1 = dense(ks[0], 3, 64);     b1 = jnp.zeros((1, 64), jnp.float32)
    w2 = dense(ks[1], 64, 256);   b2 = jnp.zeros((1, 256), jnp.float32)
    w3 = dense(ks[2], 256, 128);  b3 = jnp.zeros((1, 128), jnp.float32)
    l1 = dense(ks[3], 128, 128);  g1 = dense(ks[4], 128, 128)
    d1 = jnp.zeros((1, 128), jnp.float32)
    l2 = dense(ks[5], 128, 1);    g2 = dense(ks[6], 128, 1)
    d2 = jnp.zeros((1, 1), jnp.float32)
    return (w1, b1, w2, b2, w3, b3, l1, g1, d1, l2, g2, d2)


if __name__ == "__main__":
    key = jax.random.PRNGKey(0)
    kx, kx2, kp = jax.random.split(key, 3)

    B, N, C, L = 2, 8, 3, 16                       # PyTorch layout (B, N, C, L)
    x_torch_layout = jax.random.normal(kx, (B, N, C, L), jnp.float32)
    x_bnlc = jnp.transpose(x_torch_layout, (0, 1, 3, 2))   # -> (B, N, L, C)

    params = init_params(kp)

    out = deepsets_forward(x_bnlc, params)
    out = jax.block_until_ready(out)
    assert out.shape == (B, N)

    # Tight check against a reference using the same bf16/f32 mixed precision.
    ref_m = reference_forward_matched(x_bnlc, params)
    assert jnp.allclose(out, ref_m, atol=2e-3, rtol=2e-3), \
        float(jnp.max(jnp.abs(out - ref_m)))

    # Loose check against the pure-fp32 module semantics (bf16 MXU inputs drift).
    ref_f = reference_forward_f32(x_bnlc, params)
    assert jnp.allclose(out, ref_f, atol=1e-1, rtol=1e-1), \
        float(jnp.max(jnp.abs(out - ref_f)))

    # log_softmax rows must normalize to 1 in probability space.
    assert jnp.allclose(jnp.sum(jnp.exp(out), axis=1), 1.0, atol=1e-4)

    # Ragged-tail check: B not divisible by the batch tile (forces a padded
    # last block).  Padded batches must never leak into valid rows.
    B2 = 3
    x2_torch = jax.random.normal(kx2, (B2, N, C, L), jnp.float32)
    x2_bnlc = jnp.transpose(x2_torch, (0, 1, 3, 2))
    out2 = jax.block_until_ready(deepsets_forward(x2_bnlc, params, batch_tile=2))
    assert out2.shape == (B2, N)
    ref2 = reference_forward_matched(x2_bnlc, params)
    assert jnp.allclose(out2, ref2, atol=2e-3, rtol=2e-3), \
        float(jnp.max(jnp.abs(out2 - ref2)))
    assert jnp.allclose(jnp.sum(jnp.exp(out2), axis=1), 1.0, atol=1e-4)

    print("KERNEL_OK")
</pallas_src>

<mosaic_0001>
module attributes {stable_mosaic.version = 11 : i64} {
  func.func @deepsets_kernel(%arg0: i32, %arg1: memref<256x3xf32, #tpu.memory_space<vmem>>, %arg2: memref<3x64xf32, #tpu.memory_space<vmem>>, %arg3: memref<1x64xf32, #tpu.memory_space<vmem>>, %arg4: memref<64x256xbf16, #tpu.memory_space<vmem>>, %arg5: memref<1x256xf32, #tpu.memory_space<vmem>>, %arg6: memref<256x128xbf16, #tpu.memory_space<vmem>>, %arg7: memref<1x128xf32, #tpu.memory_space<vmem>>, %arg8: memref<128x256xbf16, #tpu.memory_space<vmem>>, %arg9: memref<1x128xf32, #tpu.memory_space<vmem>>, %arg10: memref<128x2xbf16, #tpu.memory_space<vmem>>, %arg11: memref<1x1xf32, #tpu.memory_space<vmem>>, %arg12: memref<1x16xf32, #tpu.memory_space<vmem>>) attributes {dimension_semantics = [#tpu.dimension_semantics<parallel>], iteration_bounds = array<i64: 1>, scalar_prefetch = 0 : i64, scratch_operands = 0 : i64, tpu.core_type = #tpu.core_type<tc>, window_params = [{transform_indices = @transform_0, window_bounds = array<i64: 256, 3>}, {pipeline_mode = #tpu.pipeline_mode<synchronous>, transform_indices = @transform_1, window_bounds = array<i64: 3, 64>}, {pipeline_mode = #tpu.pipeline_mode<synchronous>, transform_indices = @transform_2, window_bounds = array<i64: 1, 64>}, {pipeline_mode = #tpu.pipeline_mode<synchronous>, transform_indices = @transform_3, window_bounds = array<i64: 64, 256>}, {pipeline_mode = #tpu.pipeline_mode<synchronous>, transform_indices = @transform_4, window_bounds = array<i64: 1, 256>}, {pipeline_mode = #tpu.pipeline_mode<synchronous>, transform_indices = @transform_5, window_bounds = array<i64: 256, 128>}, {pipeline_mode = #tpu.pipeline_mode<synchronous>, transform_indices = @transform_6, window_bounds = array<i64: 1, 128>}, {pipeline_mode = #tpu.pipeline_mode<synchronous>, transform_indices = @transform_7, window_bounds = array<i64: 128, 256>}, {pipeline_mode = #tpu.pipeline_mode<synchronous>, transform_indices = @transform_8, window_bounds = array<i64: 1, 128>}, {pipeline_mode = #tpu.pipeline_mode<synchronous>, transform_indices = @transform_9, window_bounds = array<i64: 128, 2>}, {pipeline_mode = #tpu.pipeline_mode<synchronous>, transform_indices = @transform_10, window_bounds = array<i64: 1, 1>}, {transform_indices = @transform_11, window_bounds = array<i64: 1, 16>}]} {
    %c0 = arith.constant 0 : index
    %c0_0 = arith.constant 0 : index
    %0 = vector.load %arg1[%c0, %c0_0] : memref<256x3xf32, #tpu.memory_space<vmem>>, vector<256x3xf32>
    %c0_1 = arith.constant 0 : index
    %c0_2 = arith.constant 0 : index
    %1 = vector.load %arg2[%c0_1, %c0_2] : memref<3x64xf32, #tpu.memory_space<vmem>>, vector<3x64xf32>
    %2 = vector.extract_strided_slice %0 {offsets = [0, 0], sizes = [256, 1], strides = [1, 1]} : vector<256x3xf32> to vector<256x1xf32>
    %3 = vector.extract_strided_slice %1 {offsets = [0, 0], sizes = [1, 64], strides = [1, 1]} : vector<3x64xf32> to vector<1x64xf32>
    %4 = vector.broadcast %2 : vector<256x1xf32> to vector<256x64xf32>
    %5 = vector.broadcast %3 : vector<1x64xf32> to vector<256x64xf32>
    %6 = arith.mulf %4, %5 : vector<256x64xf32>
    %7 = vector.extract_strided_slice %0 {offsets = [0, 1], sizes = [256, 1], strides = [1, 1]} : vector<256x3xf32> to vector<256x1xf32>
    %8 = vector.extract_strided_slice %1 {offsets = [1, 0], sizes = [1, 64], strides = [1, 1]} : vector<3x64xf32> to vector<1x64xf32>
    %9 = vector.broadcast %7 : vector<256x1xf32> to vector<256x64xf32>
    %10 = vector.broadcast %8 : vector<1x64xf32> to vector<256x64xf32>
    %11 = arith.mulf %9, %10 : vector<256x64xf32>
    %12 = arith.addf %6, %11 : vector<256x64xf32>
    %13 = vector.extract_strided_slice %0 {offsets = [0, 2], sizes = [256, 1], strides = [1, 1]} : vector<256x3xf32> to vector<256x1xf32>
    %14 = vector.extract_strided_slice %1 {offsets = [2, 0], sizes = [1, 64], strides = [1, 1]} : vector<3x64xf32> to vector<1x64xf32>
    %15 = vector.broadcast %13 : vector<256x1xf32> to vector<256x64xf32>
    %16 = vector.broadcast %14 : vector<1x64xf32> to vector<256x64xf32>
    %17 = arith.mulf %15, %16 : vector<256x64xf32>
    %18 = arith.addf %12, %17 : vector<256x64xf32>
    %c0_3 = arith.constant 0 : index
    %c0_4 = arith.constant 0 : index
    %19 = vector.load %arg3[%c0_3, %c0_4] : memref<1x64xf32, #tpu.memory_space<vmem>>, vector<1x64xf32>
    %20 = vector.broadcast %19 : vector<1x64xf32> to vector<256x64xf32>
    %21 = arith.addf %18, %20 : vector<256x64xf32>
    %cst = arith.constant 0.000000e+00 : f32
    %22 = vector.broadcast %cst : f32 to vector<256x64xf32>
    %23 = arith.maximumf %21, %22 : vector<256x64xf32>
    %24 = arith.truncf %23 : vector<256x64xf32> to vector<256x64xbf16>
    %c0_5 = arith.constant 0 : index
    %c0_6 = arith.constant 0 : index
    %25 = vector.load %arg4[%c0_5, %c0_6] : memref<64x256xbf16, #tpu.memory_space<vmem>>, vector<64x256xbf16>
    %cst_7 = arith.constant dense<0.000000e+00> : vector<256x256xf32>
    %26 = tpu.matmul %24, %25, %cst_7 {dimension_numbers = #tpu.dot_dimension_numbers<[1], [0], [0], [1], [0, 0, 1, 1], [], []>} : vector<256x64xbf16>, vector<64x256xbf16>, vector<256x256xf32> -> vector<256x256xf32>
    %c0_8 = arith.constant 0 : index
    %c0_9 = arith.constant 0 : index
    %27 = vector.load %arg5[%c0_8, %c0_9] : memref<1x256xf32, #tpu.memory_space<vmem>>, vector<1x256xf32>
    %28 = vector.broadcast %27 : vector<1x256xf32> to vector<256x256xf32>
    %29 = arith.addf %26, %28 : vector<256x256xf32>
    %cst_10 = arith.constant 0.000000e+00 : f32
    %30 = vector.broadcast %cst_10 : f32 to vector<256x256xf32>
    %31 = arith.maximumf %29, %30 : vector<256x256xf32>
    %32 = arith.truncf %31 : vector<256x256xf32> to vector<256x256xbf16>
    %c0_11 = arith.constant 0 : index
    %c0_12 = arith.constant 0 : index
    %33 = vector.load %arg6[%c0_11, %c0_12] : memref<256x128xbf16, #tpu.memory_space<vmem>>, vector<256x128xbf16>
    %cst_13 = arith.constant dense<0.000000e+00> : vector<256x128xf32>
    %34 = tpu.matmul %32, %33, %cst_13 {dimension_numbers = #tpu.dot_dimension_numbers<[1], [0], [0], [1], [0, 0, 1, 1], [], []>} : vector<256x256xbf16>, vector<256x128xbf16>, vector<256x128xf32> -> vector<256x128xf32>
    %c0_14 = arith.constant 0 : index
    %c0_15 = arith.constant 0 : index
    %35 = vector.load %arg7[%c0_14, %c0_15] : memref<1x128xf32, #tpu.memory_space<vmem>>, vector<1x128xf32>
    %36 = vector.broadcast %35 : vector<1x128xf32> to vector<256x128xf32>
    %37 = arith.addf %34, %36 : vector<256x128xf32>
    %cst_16 = arith.constant 0.000000e+00 : f32
    %38 = vector.broadcast %cst_16 : f32 to vector<256x128xf32>
    %39 = arith.maximumf %37, %38 : vector<256x128xf32>
    %40 = vector.shape_cast %39 : vector<256x128xf32> to vector<2x8x16x128xf32>
    %cst_17 = arith.constant dense<0xFF800000> : vector<2x8x128xf32>
    %41 = vector.multi_reduction <maximumf>, %40, %cst_17 [2] : vector<2x8x16x128xf32> to vector<2x8x128xf32>
    %42 = vector.shape_cast %41 : vector<2x8x128xf32> to vector<16x128xf32>
    %43 = arith.truncf %42 : vector<16x128xf32> to vector<16x128xbf16>
    %c0_18 = arith.constant 0 : index
    %c0_19 = arith.constant 0 : index
    %44 = vector.load %arg8[%c0_18, %c0_19] : memref<128x256xbf16, #tpu.memory_space<vmem>>, vector<128x256xbf16>
    %cst_20 = arith.constant dense<0.000000e+00> : vector<16x256xf32>
    %45 = tpu.matmul %43, %44, %cst_20 {dimension_numbers = #tpu.dot_dimension_numbers<[1], [0], [0], [1], [0, 0, 1, 1], [], []>} : vector<16x128xbf16>, vector<128x256xbf16>, vector<16x256xf32> -> vector<16x256xf32>
    %46 = vector.shape_cast %45 : vector<16x256xf32> to vector<2x8x256xf32>
    %47 = vector.extract_strided_slice %46 {offsets = [0, 0, 0], sizes = [2, 8, 128], strides = [1, 1, 1]} : vector<2x8x256xf32> to vector<2x8x128xf32>
    %48 = vector.extract_strided_slice %46 {offsets = [0, 0, 128], sizes = [2, 8, 128], strides = [1, 1, 1]} : vector<2x8x256xf32> to vector<2x8x128xf32>
    %cst_21 = arith.constant dense<0.000000e+00> : vector<2x128xf32>
    %49 = vector.multi_reduction <add>, %48, %cst_21 [1] : vector<2x8x128xf32> to vector<2x128xf32>
    %50 = vector.shape_cast %49 : vector<2x128xf32> to vector<2x1x128xf32>
    %cst_22 = arith.constant 8.000000e+00 : f32
    %51 = vector.broadcast %cst_22 : f32 to vector<2x1x128xf32>
    %52 = arith.divf %50, %51 : vector<2x1x128xf32>
    %53 = vector.broadcast %52 : vector<2x1x128xf32> to vector<2x8x128xf32>
    %54 = arith.addf %47, %53 : vector<2x8x128xf32>
    %c0_23 = arith.constant 0 : index
    %c0_24 = arith.constant 0 : index
    %55 = vector.load %arg9[%c0_23, %c0_24] : memref<1x128xf32, #tpu.memory_space<vmem>>, vector<1x128xf32>
    %56 = vector.shape_cast %55 : vector<1x128xf32> to vector<1x1x128xf32>
    %57 = vector.broadcast %56 : vector<1x1x128xf32> to vector<2x8x128xf32>
    %58 = arith.addf %54, %57 : vector<2x8x128xf32>
    %cst_25 = arith.constant 0.000000e+00 : f32
    %59 = vector.broadcast %cst_25 : f32 to vector<2x8x128xf32>
    %60 = arith.maximumf %58, %59 : vector<2x8x128xf32>
    %61 = vector.shape_cast %60 : vector<2x8x128xf32> to vector<16x128xf32>
    %62 = arith.truncf %61 : vector<16x128xf32> to vector<16x128xbf16>
    %c0_26 = arith.constant 0 : index
    %c0_27 = arith.constant 0 : index
    %63 = vector.load %arg10[%c0_26, %c0_27] : memref<128x2xbf16, #tpu.memory_space<vmem>>, vector<128x2xbf16>
    %cst_28 = arith.constant dense<0.000000e+00> : vector<16x2xf32>
    %64 = tpu.matmul %62, %63, %cst_28 {dimension_numbers = #tpu.dot_dimension_numbers<[1], [0], [0], [1], [0, 0, 1, 1], [], []>} : vector<16x128xbf16>, vector<128x2xbf16>, vector<16x2xf32> -> vector<16x2xf32>
    %65 = vector.shape_cast %64 : vector<16x2xf32> to vector<2x8x2xf32>
    %66 = vector.extract_strided_slice %65 {offsets = [0, 0, 0], sizes = [2, 8, 1], strides = [1, 1, 1]} : vector<2x8x2xf32> to vector<2x8x1xf32>
    %67 = vector.shape_cast %66 : vector<2x8x1xf32> to vector<2x8xf32>
    %68 = vector.extract_strided_slice %65 {offsets = [0, 0, 1], sizes = [2, 8, 1], strides = [1, 1, 1]} : vector<2x8x2xf32> to vector<2x8x1xf32>
    %69 = vector.shape_cast %68 : vector<2x8x1xf32> to vector<2x8xf32>
    %cst_29 = arith.constant dense<0.000000e+00> : vector<2xf32>
    %70 = vector.multi_reduction <add>, %69, %cst_29 [1] : vector<2x8xf32> to vector<2xf32>
    %71 = vector.shape_cast %70 : vector<2xf32> to vector<2x1xf32>
    %cst_30 = arith.constant 8.000000e+00 : f32
    %72 = vector.broadcast %cst_30 : f32 to vector<2x1xf32>
    %73 = arith.divf %71, %72 : vector<2x1xf32>
    %74 = vector.broadcast %73 : vector<2x1xf32> to vector<2x8xf32>
    %75 = arith.addf %67, %74 : vector<2x8xf32>
    %c0_31 = arith.constant 0 : index
    %c0_32 = arith.constant 0 : index
    %76 = vector.load %arg11[%c0_31, %c0_32] : memref<1x1xf32, #tpu.memory_space<vmem>>, vector<1x1xf32>
    %77 = vector.broadcast %76 : vector<1x1xf32> to vector<2x8xf32>
    %78 = arith.addf %75, %77 : vector<2x8xf32>
    %cst_33 = arith.constant dense<0xFF800000> : vector<2xf32>
    %79 = vector.multi_reduction <maximumf>, %78, %cst_33 [1] : vector<2x8xf32> to vector<2xf32>
    %80 = vector.shape_cast %79 : vector<2xf32> to vector<2x1xf32>
    %81 = vector.broadcast %80 : vector<2x1xf32> to vector<2x8xf32>
    %82 = arith.subf %78, %81 : vector<2x8xf32>
    %83 = math.exp %82 : vector<2x8xf32>
    %cst_34 = arith.constant dense<0.000000e+00> : vector<2xf32>
    %84 = vector.multi_reduction <add>, %83, %cst_34 [1] : vector<2x8xf32> to vector<2xf32>
    %85 = vector.shape_cast %84 : vector<2xf32> to vector<2x1xf32>
    %86 = math.log %85 : vector<2x1xf32>
    %87 = vector.broadcast %86 : vector<2x1xf32> to vector<2x8xf32>
    %88 = arith.subf %82, %87 : vector<2x8xf32>
    %89 = vector.shape_cast %88 : vector<2x8xf32> to vector<1x16xf32>
    %c0_35 = arith.constant 0 : index
    %c0_36 = arith.constant 0 : index
    %90 = vector.load %arg12[%c0_35, %c0_36] : memref<1x16xf32, #tpu.memory_space<vmem>>, vector<1x16xf32>
    tpu.vector_store %arg12[%c0_35, %c0_36], %89 {strides = array<i32>} : memref<1x16xf32, #tpu.memory_space<vmem>>, vector<1x16xf32>,
    return
  }
  func.func @transform_0(%arg0: i32) -> (i32, i32) {
    %c0_i32 = arith.constant 0 : i32
    %c0_i32_0 = arith.constant 0 : i32
    return %arg0, %c0_i32 : i32, i32
  }
  func.func @transform_1(%arg0: i32) -> (i32, i32) {
    %c0_i32 = arith.constant 0 : i32
    %c0_i32_0 = arith.constant 0 : i32
    %c0_i32_1 = arith.constant 0 : i32
    return %c0_i32, %c0_i32_0 : i32, i32
  }
  func.func @transform_2(%arg0: i32) -> (i32, i32) {
    %c0_i32 = arith.constant 0 : i32
    %c0_i32_0 = arith.constant 0 : i32
    %c0_i32_1 = arith.constant 0 : i32
    return %c0_i32, %c0_i32_0 : i32, i32
  }
  func.func @transform_3(%arg0: i32) -> (i32, i32) {
    %c0_i32 = arith.constant 0 : i32
    %c0_i32_0 = arith.constant 0 : i32
    %c0_i32_1 = arith.constant 0 : i32
    return %c0_i32, %c0_i32_0 : i32, i32
  }
  func.func @transform_4(%arg0: i32) -> (i32, i32) {
    %c0_i32 = arith.constant 0 : i32
    %c0_i32_0 = arith.constant 0 : i32
    %c0_i32_1 = arith.constant 0 : i32
    return %c0_i32, %c0_i32_0 : i32, i32
  }
  func.func @transform_5(%arg0: i32) -> (i32, i32) {
    %c0_i32 = arith.constant 0 : i32
    %c0_i32_0 = arith.constant 0 : i32
    %c0_i32_1 = arith.constant 0 : i32
    return %c0_i32, %c0_i32_0 : i32, i32
  }
  func.func @transform_6(%arg0: i32) -> (i32, i32) {
    %c0_i32 = arith.constant 0 : i32
    %c0_i32_0 = arith.constant 0 : i32
    %c0_i32_1 = arith.constant 0 : i32
    return %c0_i32, %c0_i32_0 : i32, i32
  }
  func.func @transform_7(%arg0: i32) -> (i32, i32) {
    %c0_i32 = arith.constant 0 : i32
    %c0_i32_0 = arith.constant 0 : i32
    %c0_i32_1 = arith.constant 0 : i32
    return %c0_i32, %c0_i32_0 : i32, i32
  }
  func.func @transform_8(%arg0: i32) -> (i32, i32) {
    %c0_i32 = arith.constant 0 : i32
    %c0_i32_0 = arith.constant 0 : i32
    %c0_i32_1 = arith.constant 0 : i32
    return %c0_i32, %c0_i32_0 : i32, i32
  }
  func.func @transform_9(%arg0: i32) -> (i32, i32) {
    %c0_i32 = arith.constant 0 : i32
    %c0_i32_0 = arith.constant 0 : i32
    %c0_i32_1 = arith.constant 0 : i32
    return %c0_i32, %c0_i32_0 : i32, i32
  }
  func.func @transform_10(%arg0: i32) -> (i32, i32) {
    %c0_i32 = arith.constant 0 : i32
    %c0_i32_0 = arith.constant 0 : i32
    %c0_i32_1 = arith.constant 0 : i32
    return %c0_i32, %c0_i32_0 : i32, i32
  }
  func.func @transform_11(%arg0: i32) -> (i32, i32) {
    %c0_i32 = arith.constant 0 : i32
    %c0_i32_0 = arith.constant 0 : i32
    return %arg0, %c0_i32 : i32, i32
  }
}

</mosaic_0001>

<bundles_post_ra>
// kernel: tpu_custom_call.1
= control target key start
LH: loop header
LB: loop body
LE: loop exit
PB: predicated region body
PF: predicated region fallthrough
CT: control target
= control target key end

     0   :  { %s3325_s0 = inlined_call_operand.vmem [shape: f32[256,3], index: 0, kind: input, shape index: {}]   ;;  %s3326_s1 = inlined_call_operand.vmem [shape: f32[3,64], index: 1, kind: input, shape index: {}]   ;;  %s3327_s2 = inlined_call_operand.hbm [shape: f32[1,64], index: 2, kind: input, shape index: {}]   ;;  %s3328_s3 = inlined_call_operand.vmem [shape: bf16[64,256], index: 3, kind: input, shape index: {}]   ;;  %s3329_s4 = inlined_call_operand.vmem [shape: f32[1,256], index: 4, kind: input, shape index: {}]   ;;  %s3330_s5 = inlined_call_operand.vmem [shape: bf16[256,128], index: 5, kind: input, shape index: {}]   ;;  %s3331_s6 = inlined_call_operand.vmem [shape: f32[1,128], index: 6, kind: input, shape index: {}]   ;;  %s3332_s7 = inlined_call_operand.vmem [shape: bf16[128,256], index: 7, kind: input, shape index: {}]   ;;  %s3333_s8 = inlined_call_operand.vmem [shape: f32[1,128], index: 8, kind: input, shape index: {}]   ;;  %s3334_s9 = inlined_call_operand.vmem [shape: bf16[128,2], index: 9, kind: input, shape index: {}]   ;;  %s3335_s10 = inlined_call_operand.<no memory space> [shape: f32[1,1], index: 10, kind: input, shape index: {}]   ;;  %s3336_s11 = inlined_call_operand.hbm [shape: f32[1,16], index: 11, kind: output, shape index: {}]  }
   0x1   :  { %v16_v0 = vstv %s3335_s10 }
   0x2   :  { %17 = vst [vmem:[#allocation2] sm:$0x1] %v16_v0 }
   0x3   :  { %18 = vsyncpa [#allocation4], 0 }
   0x4   :  { %19 = vsyncpa [#allocation5], 0  ;;  %s2490_s19 = smov [#allocation3]  }
   0x5   :  { %s30_s20 = sshll.u32 %s2490_s19, 4  ;;  %s31_s20 = int_to_ptr.vmem [resolvable:$true] %s30_s20 }
   0x6   :  { %s2454_s21 = scalar_lea.vmem %s31_s20, 16  ;;  %s2458_s22 = scalar_lea.vmem %s31_s20, 32 }
   0x7   :  { %p2455_p0 = scmp.ne.s32.totalorder %s31_s20, %s2454_s21  ;;  %p2459_p1 = scmp.lt.s32.totalorder %s31_s20, %s31_s20 }
   0x8   :  { %p2460_p2 = scmp.lt.s32.totalorder %s2458_s22, %s2454_s21 }
   0xa   :  { %p2461_p3 = por %p2460_p2, %p2459_p1 }
   0xc   :  { %p2462_p4 = pnand %p2461_p3, %p2455_p0 }
   0xe   :  { %2465 = shalt.err (!%p2462_p4)
}
   0xf   :  { %33 = dma.hbm_to_vmem [thread:$0]  %s3327_s2, 16, %s31_s20, [#allocation4]  }
  0x10   :  { %2486 = dma.done.wait [#allocation4], 16  }
  0x11   :  { %2487 = vsyncadd [#allocation4], 4294967280  ;;  %v2491_v1 = vmov 2   ;;  %v2492_v2 = vmov 1   ;;  %v2493_v3 = vmov 0   ;;  %v54_v4 = vld [vmem:[%s3325_s0] sm:$0xff]  ;;  %v247_v40 = vlaneseq }
  0x12   :  { %2322 = vset.pattern.permute.xlu0 %v2491_v1  ;;  %2321 = vset.pattern.permute.xlu1 %v2492_v2  ;;  %v56_v5 = vld [vmem:[%s3325_s0 + $0x10] sm:$0xff]  ;;  %v55_v6 = vld [vmem:[%s3325_s0 + $0x8] sm:$0xff]  ;;  %v58_v7 = vld [vmem:[%s3325_s0 + $0x20] sm:$0xff]  ;;  %vm822_vm0 = vcmask 523264   ;;  %vm1664_vm1 = vcmask 1041409   ;;  %vm1666_vm2 = vcmask 1042434  }
  0x13   :  { %903 = vmatprep.mubr.bf16.mxu0 %v2493_v3  ;;  %480 = vperm.xlu0 %2322, %v54_v4   ;;  %v2379_v8 = vld [vmem:[%s3328_s3 + $0x34] ss:$8 sps:$4 sm:$0xff]   ;;  %v2381_v9 = vld [vmem:[%s3328_s3 + $0x30] ss:$8 sps:$4 sm:$0xff]   ;;  %v2382_v10 = vld [vmem:[%s3328_s3 + $0x24] ss:$8 sps:$4 sm:$0xff]  }
  0x14   :  { %284 = vperm.xlu1 %2321, %v54_v4   ;;  %879 = vmatprep.subr.bf16.mxu0 %v2379_v8  ;;  %v2384_v11 = vld [vmem:[%s3328_s3 + $0x20] ss:$8 sps:$4 sm:$0xff]   ;;  %v2385_v12 = vld [vmem:[%s3328_s3 + $0x14] ss:$8 sps:$4 sm:$0xff]   ;;  %v2387_v13 = vld [vmem:[%s3328_s3 + $0x10] ss:$8 sps:$4 sm:$0xff]  }
  0x15   :  { %880 = vmatpush1.bf16.msra.mxu0 %v2381_v9  ;;  %v57_v14 = vld [vmem:[%s3325_s0 + $0x18] sm:$0xff]  ;;  %v2388_v15 = vld [vmem:[%s3328_s3 + $0x4] ss:$8 sps:$4 sm:$0xff]   ;;  %v2390_v16 = vld [vmem:[%s3328_s3] ss:$8 sps:$4 sm:$0xff]   ;;  %v2745_v43 = vshrl.u32 %v247_v40, 7 }
  0x16   :  { %881 = vmatprep.subr.bf16.mxu0 %v2382_v10  ;;  %v59_v17 = vld [vmem:[%s3325_s0 + $0x28] sm:$0xff]  ;;  %v61_v18 = vld [vmem:[%s3325_s0 + $0x38] sm:$0xff]  ;;  %v60_v23 = vld [vmem:[%s3325_s0 + $0x30] sm:$0xff]  ;;  %vm1668_vm3 = vcmask 1043459   ;;  %vm1670_vm4 = vcmask 1044484   ;;  %vm1672_vm5 = vcmask 1045509  }
  0x17   :  { %488 = vperm.xlu0 %2322, %v56_v5   ;;  %v63_v19 = vld [vmem:[%s3325_s0 + $0x48] sm:$0xff]  ;;  %v65_v20 = vld [vmem:[%s3325_s0 + $0x58] sm:$0xff]  ;;  %v62_v24 = vld [vmem:[%s3325_s0 + $0x40] sm:$0xff]  ;;  %v2750_v46 = vsub.s32 1, %v2745_v43  ;;  %v2753_v47 = vsub.s32 0, %v2745_v43  ;;  %v609_v49 = vsub.s32 2, %v2745_v43 }
  0x18   :  { %288 = vperm.xlu1 %2321, %v55_v6   ;;  %v2627_v21 = vld [vmem:[%s3325_s0 + $0x68] sm:$0xff]  ;;  %v2633_v22 = vld [vmem:[%s3325_s0 + $0x78] sm:$0xff]  ;;  %v64_v25 = vld [vmem:[%s3325_s0 + $0x50] sm:$0xff]  ;;  %vm1674_vm6 = vcmask 1046534   ;;  %vm1676_vm7 = vcmask 1047559   ;;  %vm2495_vm8 = vmmov 0  }
  0x19   :  { %882 = vmatpush1.bf16.msra.mxu0 %v2384_v11  ;;  %v66_v26 = vld [vmem:[%s3325_s0 + $0x60] sm:$0xff]  ;;  %v2656_v27 = vld [vmem:[%s3325_s0 + $0x70] sm:$0xff]  ;;  %v2682_v31 = vld [vmem:[%s3325_s0 + $0x88] sm:$0xff]  ;;  %vm1964_vm9 = vcmask 58368   ;;  %vm2085_vm10 = vcmask 130112   ;;  %vm2088_vm11 = vcmask 122880  }
  0x1a   :  { %883 = vmatprep.subr.bf16.mxu0 %v2385_v12  ;;  %v2662_v28 = vld [vmem:[%s3325_s0 + $0x80] sm:$0xff]  ;;  %v2669_v29 = vld [vmem:[%s3325_s0 + $0x90] sm:$0xff]  ;;  %v2690_v32 = vld [vmem:[%s3325_s0 + $0x98] sm:$0xff] }
  0x1b   :  { %496 = vperm.xlu0 %2322, %v58_v7   ;;  %v2676_v30 = vld [vmem:[%s3325_s0 + $0xa0] sm:$0xff]  ;;  %v2696_v33 = vld [vmem:[%s3325_s0 + $0xa8] sm:$0xff]  ;;  %v2703_v34 = vld [vmem:[%s3325_s0 + $0xb8] sm:$0xff] }
  0x1c   :  { %2323 = vset.pattern.permute.xlu1 %v2491_v1  ;;  %v2710_v35 = vld [vmem:[%s3325_s0 + $0xc8] sm:$0xff]  ;;  %v2716_v36 = vld [vmem:[%s3325_s0 + $0xd8] sm:$0xff]  ;;  %v2723_v37 = vld [vmem:[%s3325_s0 + $0xb0] sm:$0xff] }
  0x1d   :  { %484 = vperm.xlu1 %2323, %v55_v6   ;;  %884 = vmatpush1.bf16.msra.mxu0 %v2387_v13  ;;  %v2731_v38 = vld [vmem:[%s3325_s0 + $0xc0] sm:$0xff]  ;;  %v2738_v39 = vld [vmem:[%s3325_s0 + $0xd0] sm:$0xff] }
  0x1e   :  { %885 = vmatprep.subr.bf16.mxu0 %v2388_v15  ;;  %v86_v48 = vld [vmem:[%s3326_s1] sm:$0x7] }
  0x1f   :  { %2329 = vset.pattern.permute.xlu0 %v2493_v3  ;;  %v2765_v52 = vld [vmem:[%s3325_s0 + $0xe0] sm:$0xff]  ;;  %v2768_v53 = vrot.slane %v86_v48, %v2750_v46  ;;  %v2772_v54 = vrot.slane %v86_v48, %v2753_v47  ;;  %v2775_v55 = vrot.slane %v86_v48, %v609_v49 }
  0x20   :  { %89 = vperm.xlu0 %2329, %v54_v4  }
  0x21   :  { %2324 = vset.pattern.permute.xlu1 %v2493_v3  ;;  %886 = vmatpush1.bf16.msra.mxu0 %v2390_v16 }
  0x22   :  { %99 = vperm.xlu1 %2324, %v56_v5  }
  0x24   :  { %94 = vperm.xlu0 %2329, %v55_v6   ;;  %v2790_v6 = vld [vmem:[#allocation3] ss:$0 sm:$0xff] }
  0x26   :  { %2325 = vset.pattern.permute.xlu1 %v2492_v2 }
  0x27   :  { %292 = vperm.xlu1 %2325, %v56_v5   ;;  %v2788_v5 = vld [vmem:[%s3325_s0 + $0xe8] sm:$0xff] }
  0x28   :  { %104 = vperm.xlu0 %2329, %v57_v14  }
  0x2b   :  { %296 = vperm.xlu1 %2325, %v57_v14  }
  0x2c   :  { %114 = vperm.xlu0 %2329, %v59_v17  }
  0x2f   :  { %2326 = vset.pattern.permute.xlu1 %v2491_v1 }
  0x30   :  { %492 = vperm.xlu1 %2326, %v57_v14   ;;  %124 = vperm.xlu0 %2329, %v61_v18  }
  0x34   :  { %2327 = vset.pattern.permute.xlu1 %v2493_v3  ;;  %134 = vperm.xlu0 %2329, %v63_v19  }
  0x35   :  { %109 = vperm.xlu1 %2327, %v58_v7  }
  0x38   :  { %144 = vperm.xlu0 %2329, %v65_v20  }
  0x39   :  { %2328 = vset.pattern.permute.xlu1 %v2492_v2 }
  0x3a   :  { %300 = vperm.xlu1 %2328, %v58_v7  }
  0x3c   :  { %154 = vperm.xlu0 %2329, %v2627_v21  }
  0x3e   :  { %304 = vperm.xlu1 %2328, %v59_v17  }
  0x40   :  { %164 = vperm.xlu0 %2329, %v2633_v22  }
  0x42   :  { %2330 = vset.pattern.permute.xlu1 %v2491_v1 }
  0x43   :  { %500 = vperm.xlu1 %2330, %v59_v17  }
  0x44   :  { %2344 = vset.pattern.permute.xlu0 %v2491_v1 }
  0x45   :  { %504 = vperm.xlu0 %2344, %v60_v23  }
  0x47   :  { %2331 = vset.pattern.permute.xlu1 %v2493_v3 }
  0x48   :  { %119 = vperm.xlu1 %2331, %v60_v23  }
  0x49   :  { %512 = vperm.xlu0 %2344, %v62_v24  }
  0x4c   :  { %2332 = vset.pattern.permute.xlu1 %v2492_v2 }
  0x4d   :  { %308 = vperm.xlu1 %2332, %v60_v23   ;;  %520 = vperm.xlu0 %2344, %v64_v25  }
  0x51   :  { %312 = vperm.xlu1 %2332, %v61_v18   ;;  %528 = vperm.xlu0 %2344, %v66_v26  }
  0x55   :  { %2333 = vset.pattern.permute.xlu1 %v2491_v1  ;;  %536 = vperm.xlu0 %2344, %v2656_v27  }
  0x56   :  { %508 = vperm.xlu1 %2333, %v61_v18  }
  0x59   :  { %544 = vperm.xlu0 %2344, %v2662_v28  }
  0x5a   :  { %2334 = vset.pattern.permute.xlu1 %v2493_v3 }
  0x5b   :  { %129 = vperm.xlu1 %2334, %v62_v24  }
  0x5d   :  { %552 = vperm.xlu0 %2344, %v2669_v29  }
  0x5f   :  { %2335 = vset.pattern.permute.xlu1 %v2492_v2 }
  0x60   :  { %316 = vperm.xlu1 %2335, %v62_v24  }
  0x61   :  { %560 = vperm.xlu0 %2344, %v2676_v30  }
  0x64   :  { %320 = vperm.xlu1 %2335, %v63_v19  }
  0x65   :  { %2355 = vset.pattern.permute.xlu0 %v2493_v3 }
  0x66   :  { %174 = vperm.xlu0 %2355, %v2682_v31  }
  0x68   :  { %2336 = vset.pattern.permute.xlu1 %v2491_v1 }
  0x69   :  { %516 = vperm.xlu1 %2336, %v63_v19  }
  0x6a   :  { %184 = vperm.xlu0 %2355, %v2690_v32  }
  0x6d   :  { %2337 = vset.pattern.permute.xlu1 %v2493_v3 }
  0x6e   :  { %139 = vperm.xlu1 %2337, %v64_v25   ;;  %194 = vperm.xlu0 %2355, %v2696_v33  }
  0x72   :  { %2338 = vset.pattern.permute.xlu1 %v2492_v2  ;;  %204 = vperm.xlu0 %2355, %v2703_v34  }
  0x73   :  { %324 = vperm.xlu1 %2338, %v64_v25  }
  0x76   :  { %214 = vperm.xlu0 %2355, %v2710_v35  }
  0x77   :  { %328 = vperm.xlu1 %2338, %v65_v20  }
  0x7a   :  { %224 = vperm.xlu0 %2355, %v2716_v36  }
  0x7b   :  { %2339 = vset.pattern.permute.xlu1 %v2491_v1 }
  0x7c   :  { %524 = vperm.xlu1 %2339, %v65_v20  }
  0x7e   :  { %2364 = vset.pattern.permute.xlu0 %v2491_v1 }
  0x7f   :  { %568 = vperm.xlu0 %2364, %v2723_v37  }
  0x80   :  { %2340 = vset.pattern.permute.xlu1 %v2493_v3 }
  0x81   :  { %149 = vperm.xlu1 %2340, %v66_v26  }
  0x83   :  { %576 = vperm.xlu0 %2364, %v2731_v38  }
  0x85   :  { %2341 = vset.pattern.permute.xlu1 %v2492_v2 }
  0x86   :  { %332 = vperm.xlu1 %2341, %v66_v26  }
  0x87   :  { %584 = vperm.xlu0 %2364, %v2738_v39  }
  0x8a   :  { %336 = vperm.xlu1 %2341, %v2627_v21  }
  0x8b   :  { %592 = vperm.xlu0 %2364, %v2765_v52  }
  0x8e   :  { %2342 = vset.pattern.permute.xlu1 %v2491_v1  ;;  %v481_v42 = vpop.permute.xlu0 %480 }
  0x8f   :  { %532 = vperm.xlu1 %2342, %v2627_v21   ;;  %v285_v41 = vpop.permute.xlu1 %284  ;;  %v611_v58 = vmul.f32 %v2775_v55, %v481_v42  ;;  %2369 = vset.pattern.permute.xlu0 %v2493_v3 }
  0x90   :  { %v415_v57 = vmul.f32 %v2768_v53, %v285_v41  ;;  %234 = vperm.xlu0 %2369, %v2788_v5  }
  0x92   :  { %v489_v45 = vpop.permute.xlu0 %488 }
  0x93   :  { %2343 = vset.pattern.permute.xlu1 %v2493_v3  ;;  %v289_v44 = vpop.permute.xlu1 %288  ;;  %v613_v15 = vmul.f32 %v2775_v55, %v489_v45 }
  0x94   :  { %159 = vperm.xlu1 %2343, %v2656_v27   ;;  %v416_v63 = vmul.f32 %v2768_v53, %v289_v44  ;;  %v2811_v44 = vld [vmem:[%s3325_s0 + $0xf8] sm:$0xff] }
  0x95   :  { %244 = vperm.xlu0 %2369, %v2811_v44  }
  0x96   :  { %v2759_v50 = vpop.permute.xlu0 %496 }
  0x98   :  { %2345 = vset.pattern.permute.xlu1 %v2492_v2  ;;  %v485_v51 = vpop.permute.xlu1 %484 }
  0x99   :  { %340 = vperm.xlu1 %2345, %v2656_v27   ;;  %v612_v8 = vmul.f32 %v2775_v55, %v485_v51  ;;  %2373 = vset.pattern.permute.xlu0 %v2491_v1 }
  0x9b   :  { %v90_v56 = vpop.permute.xlu0 %89 }
  0x9c   :  { %v251_v59 = vmul.f32 %v2772_v54, %v90_v56 }
  0x9d   :  { %344 = vperm.xlu1 %2345, %v2633_v22   ;;  %v100_v60 = vpop.permute.xlu1 %99 }
  0x9e   :  { %v447_v61 = vadd.f32 %v415_v57, %v251_v59  ;;  %v253_v11 = vmul.f32 %v2772_v54, %v100_v60 }
  0x9f   :  { %v95_v62 = vpop.permute.xlu0 %94 }
  0xa0   :  { %v643_v0 = vadd.f32 %v611_v58, %v447_v61  ;;  %v252_v4 = vmul.f32 %v2772_v54, %v95_v62  ;;  %v2823_v58 = vld [vmem:[%s3325_s0 + $0xf0] sm:$0xff] }
  0xa1   :  { %2346 = vset.pattern.permute.xlu1 %v2491_v1  ;;  %600 = vperm.xlu0 %2373, %v2823_v58  }
  0xa2   :  { %540 = vperm.xlu1 %2346, %v2633_v22   ;;  %v293_v7 = vpop.permute.xlu1 %292  ;;  %v448_v9 = vadd.f32 %v416_v63, %v252_v4  ;;  %v682_v13 = vadd.f32 %v2790_v6, %v643_v0  ;;  %v615_v0 = vmul.f32 %v2775_v55, %v2759_v50 }
  0xa3   :  { %v417_v10 = vmul.f32 %v2768_v53, %v293_v7  ;;  %v105_v12 = vpop.permute.xlu0 %104 }
  0xa4   :  { %v644_v14 = vadd.f32 %v612_v8, %v448_v9  ;;  %v254_v19 = vmul.f32 %v2772_v54, %v105_v12  ;;  %v714_v22 = vmax.f32 %v682_v13, 0.0 }
  0xa5   :  { %v449_v16 = vadd.f32 %v417_v10, %v253_v11  ;;  %2376 = vset.pattern.permute.xlu0 %v2492_v2 }
  0xa6   :  { %2347 = vset.pattern.permute.xlu1 %v2493_v3  ;;  %v297_v17 = vpop.permute.xlu1 %296  ;;  %v683_v18 = vadd.f32 %v2790_v6, %v644_v14 }
  0xa7   :  { %169 = vperm.xlu1 %2347, %v2662_v28   ;;  %v418_v20 = vmul.f32 %v2768_v53, %v297_v17  ;;  %v115_v21 = vpop.permute.xlu0 %114  ;;  %v645_v24 = vadd.f32 %v613_v15, %v449_v16 }
  0xa8   :  { %v715_v23 = vmax.f32 %v683_v18, 0.0  ;;  %v256_v7 = vmul.f32 %v2772_v54, %v115_v21 }
  0xa9   :  { %v450_v27 = vadd.f32 %v418_v20, %v254_v19  ;;  %v684_v45 = vadd.f32 %v2790_v6, %v645_v24 }
  0xaa   :  { %v746_v26 = vpack.c.bf16 %v715_v23, %v714_v22 }
  0xab   :  { %2348 = vset.pattern.permute.xlu1 %v2492_v2  ;;  %v493_v25 = vpop.permute.xlu1 %492  ;;  %v125_v42 = vpop.permute.xlu0 %124  ;;  %v716_v56 = vmax.f32 %v684_v45, 0.0 }
  0xac   :  { %v614_v41 = vmul.f32 %v2775_v55, %v493_v25  ;;  %348 = vperm.xlu1 %2348, %v2662_v28   ;;  %2114 = vmatmul.mubr.msk.bf16.vlgmr.msra.gmra.mxu0 %vm822_vm0, %v746_v26 }
  0xad   :  { %913 = vmatprep.mubr.bf16.mxu0 %v2493_v3 }
  0xae   :  { %v646_v48 = vadd.f32 %v614_v41, %v450_v27 }
  0xaf   :  { %v2818_v51 = vpop.permute.xlu0 %134 }
  0xb0   :  { %v685_v49 = vadd.f32 %v2790_v6, %v646_v48  ;;  %352 = vperm.xlu1 %2348, %v2682_v31   ;;  %v110_v28 = vpop.permute.xlu1 %109 }
  0xb1   :  { %v255_v62 = vmul.f32 %v2772_v54, %v110_v28 }
  0xb2   :  { %v717_v57 = vmax.f32 %v685_v49, 0.0 }
  0xb3   :  { %v2832_v63 = vpop.permute.xlu0 %144 }
  0xb4   :  { %2349 = vset.pattern.permute.xlu1 %v2491_v1  ;;  %v747_v59 = vpack.c.bf16 %v717_v57, %v716_v56 }
  0xb5   :  { %548 = vperm.xlu1 %2349, %v2682_v31   ;;  %v301_v60 = vpop.permute.xlu1 %300 }
  0xb6   :  { %v419_v61 = vmul.f32 %v2768_v53, %v301_v60  ;;  %2115 = vmatmul.mubr.msk.bf16.gmra.mxu0 %vm822_vm0, %v747_v59 }
  0xb7   :  { %923 = vmatprep.mubr.bf16.mxu0 %v2493_v3  ;;  %v2842_v10 = vpop.permute.xlu0 %154 }
  0xb8   :  { %v451_v4 = vadd.f32 %v419_v61, %v255_v62  ;;  %v2391_v61 = vld [vmem:[%s3330_s5 + $0x78] sm:$0xff]  }
  0xb9   :  { %2350 = vset.pattern.permute.xlu1 %v2493_v3  ;;  %v305_v31 = vpop.permute.xlu1 %304  ;;  %2173 = vmatprep.subr.bf16.mxu1 %v2391_v61  ;;  %v262_v61 = vmul.f32 %v2772_v54, %v2832_v63 }
  0xba   :  { %179 = vperm.xlu1 %2350, %v2669_v29   ;;  %v420_v8 = vmul.f32 %v2768_v53, %v305_v31  ;;  %v647_v9 = vadd.f32 %v615_v0, %v451_v4 }
  0xbb   :  { %v2850_v17 = vpop.permute.xlu0 %164 }
  0xbc   :  { %v452_v12 = vadd.f32 %v420_v8, %v256_v7  ;;  %v686_v50 = vadd.f32 %v2790_v6, %v647_v9  ;;  %v2393_v8 = vld [vmem:[%s3330_s5 + $0x70] sm:$0xff]  }
  0xbe   :  { %2351 = vset.pattern.permute.xlu1 %v2492_v2  ;;  %v501_v11 = vpop.permute.xlu1 %500  ;;  %v718_v18 = vmax.f32 %v686_v50, 0.0 }
  0xbf   :  { %v616_v13 = vmul.f32 %v2775_v55, %v501_v11  ;;  %356 = vperm.xlu1 %2351, %v2669_v29  }
  0xc0   :  { %v505_v22 = vpop.permute.xlu0 %504 }
  0xc1   :  { %v648_v14 = vadd.f32 %v616_v13, %v452_v12  ;;  %v617_v25 = vmul.f32 %v2775_v55, %v505_v22  ;;  %v260_v13 = vmul.f32 %v2772_v54, %v2818_v51  ;;  %v2397_v51 = vld [vmem:[%s3330_s5 + $0x60] sm:$0xff]  }
  0xc3   :  { %v687_v15 = vadd.f32 %v2790_v6, %v648_v14  ;;  %360 = vperm.xlu1 %2351, %v2690_v32   ;;  %v120_v16 = vpop.permute.xlu1 %119  ;;  %v2395_v14 = vld [vmem:[%s3330_s5 + $0x68] sm:$0xff]  }
  0xc4   :  { %v257_v23 = vmul.f32 %v2772_v54, %v120_v16  ;;  %v513_v31 = vpop.permute.xlu0 %512 }
  0xc5   :  { %v719_v19 = vmax.f32 %v687_v15, 0.0  ;;  %v619_v11 = vmul.f32 %v2775_v55, %v513_v31  ;;  %v2396_v15 = vld [vmem:[%s3330_s5 + $0x28] sm:$0xff]  }
  0xc7   :  { %2352 = vset.pattern.permute.xlu1 %v2491_v1  ;;  %v748_v20 = vpack.c.bf16 %v719_v19, %v718_v18 }
  0xc8   :  { %556 = vperm.xlu1 %2352, %v2690_v32   ;;  %v309_v21 = vpop.permute.xlu1 %308  ;;  %v258_v32 = vmul.f32 %v2772_v54, %v125_v42 }
  0xc9   :  { %v421_v29 = vmul.f32 %v2768_v53, %v309_v21  ;;  %2116 = vmatmul.mubr.msk.bf16.gmra.mxu0 %vm822_vm0, %v748_v20  ;;  %v2398_v21 = vld [vmem:[%s3330_s5 + $0x20] sm:$0xff]  }
  0xca   :  { %933 = vmatprep.mubr.bf16.mxu0 %v2493_v3 }
  0xcb   :  { %v453_v24 = vadd.f32 %v421_v29, %v257_v23 }
  0xcc   :  { %2353 = vset.pattern.permute.xlu1 %v2493_v3  ;;  %v313_v26 = vpop.permute.xlu1 %312 }
  0xcd   :  { %189 = vperm.xlu1 %2353, %v2676_v30   ;;  %v422_v27 = vmul.f32 %v2768_v53, %v313_v26  ;;  %v649_v41 = vadd.f32 %v617_v25, %v453_v24  ;;  %v2400_v25 = vld [vmem:[%s3330_s5 + $0x18] sm:$0xff]  }
  0xcf   :  { %v454_v48 = vadd.f32 %v422_v27, %v258_v32  ;;  %v688_v28 = vadd.f32 %v2790_v6, %v649_v41  ;;  %v2401_v41 = vld [vmem:[%s3330_s5 + $0x50] sm:$0xff]  }
  0xd1   :  { %2354 = vset.pattern.permute.xlu1 %v2492_v2  ;;  %v509_v45 = vpop.permute.xlu1 %508  ;;  %v720_v42 = vmax.f32 %v688_v28, 0.0  ;;  %v521_v28 = vpop.permute.xlu0 %520 }
  0xd2   :  { %v618_v49 = vmul.f32 %v2775_v55, %v509_v45  ;;  %364 = vperm.xlu1 %2354, %v2676_v30   ;;  %v2392_v30 = vld [vmem:[%s3330_s5 + $0x38] sm:$0xff]  }
  0xd3   :  { %2174 = vmatpush3.bf16.msra.mxu1 %v2392_v30  ;;  %v2405_v30 = vld [vmem:[%s3330_s5 + $0x40] sm:$0xff]  }
  0xd4   :  { %v650_v56 = vadd.f32 %v618_v49, %v454_v48  ;;  %2175 = vmatprep.subr.bf16.mxu1 %v2393_v8  ;;  %v2402_v48 = vld [vmem:[%s3330_s5 + $0x10] sm:$0xff]  }
  0xd6   :  { %v689_v57 = vadd.f32 %v2790_v6, %v650_v56  ;;  %368 = vperm.xlu1 %2354, %v2696_v33   ;;  %v130_v59 = vpop.permute.xlu1 %129 }
  0xd7   :  { %v259_v7 = vmul.f32 %v2772_v54, %v130_v59  ;;  %v621_v59 = vmul.f32 %v2775_v55, %v521_v28 }
  0xd8   :  { %v721_v60 = vmax.f32 %v689_v57, 0.0 }
  0xda   :  { %2356 = vset.pattern.permute.xlu1 %v2491_v1  ;;  %v749_v62 = vpack.c.bf16 %v721_v60, %v720_v42  ;;  %v2404_v60 = vld [vmem:[%s3330_s5 + $0x8] sm:$0xff]  }
  0xdb   :  { %564 = vperm.xlu1 %2356, %v2696_v33   ;;  %v317_v0 = vpop.permute.xlu1 %316  ;;  %v2394_v33 = vld [vmem:[%s3330_s5 + $0x30] sm:$0xff]  }
  0xdc   :  { %v423_v4 = vmul.f32 %v2768_v53, %v317_v0  ;;  %2117 = vmatmul.mubr.msk.bf16.gmra.mxu0 %vm822_vm0, %v749_v62  ;;  %2176 = vmatpush3.bf16.msra.mxu1 %v2394_v33 }
  0xdd   :  { %943 = vmatprep.mubr.bf16.mxu0 %v2493_v3  ;;  %2177 = vmatprep.subr.bf16.mxu1 %v2395_v14 }
  0xde   :  { %v455_v9 = vadd.f32 %v423_v4, %v259_v7  ;;  %v2406_v4 = vld [vmem:[%s3330_s5] sm:$0xff]  }
  0xdf   :  { %2357 = vset.pattern.permute.xlu1 %v2493_v3  ;;  %v321_v12 = vpop.permute.xlu1 %320 }
  0xe0   :  { %199 = vperm.xlu1 %2357, %v2723_v37   ;;  %v424_v50 = vmul.f32 %v2768_v53, %v321_v12  ;;  %v651_v16 = vadd.f32 %v619_v11, %v455_v9  ;;  %2178 = vmatpush3.bf16.msra.mxu1 %v2396_v15 }
  0xe1   :  { %2179 = vmatprep.subr.bf16.mxu1 %v2397_v51 }
  0xe2   :  { %v456_v19 = vadd.f32 %v424_v50, %v260_v13  ;;  %v690_v29 = vadd.f32 %v2790_v6, %v651_v16 }
  0xe4   :  { %2358 = vset.pattern.permute.xlu1 %v2492_v2  ;;  %v517_v18 = vpop.permute.xlu1 %516  ;;  %2180 = vmatpush3.bf16.msra.mxu1 %v2398_v21  ;;  %v722_v26 = vmax.f32 %v690_v29, 0.0 }
  0xe5   :  { %v620_v20 = vmul.f32 %v2775_v55, %v517_v18  ;;  %372 = vperm.xlu1 %2358, %v2723_v37   ;;  %v2399_v37 = vld [vmem:[%s3330_s5 + $0x58] sm:$0xff]  }
  0xe6   :  { %2181 = vmatprep.subr.bf16.mxu1 %v2399_v37 }
  0xe7   :  { %v652_v22 = vadd.f32 %v620_v20, %v456_v19 }
  0xe8   :  { %2182 = vmatpush3.bf16.msra.mxu1 %v2400_v25 }
  0xe9   :  { %v691_v23 = vadd.f32 %v2790_v6, %v652_v22  ;;  %376 = vperm.xlu1 %2358, %v2703_v34   ;;  %v140_v24 = vpop.permute.xlu1 %139  ;;  %2183 = vmatprep.subr.bf16.mxu1 %v2401_v41 }
  0xea   :  { %v261_v56 = vmul.f32 %v2772_v54, %v140_v24 }
  0xeb   :  { %v723_v32 = vmax.f32 %v691_v23, 0.0 }
  0xec   :  { %2184 = vmatpush3.bf16.msra.mxu1 %v2402_v48 }
  0xed   :  { %2359 = vset.pattern.permute.xlu1 %v2491_v1  ;;  %v750_v27 = vpack.c.bf16 %v723_v32, %v722_v26 }
  0xee   :  { %572 = vperm.xlu1 %2359, %v2703_v34   ;;  %v325_v45 = vpop.permute.xlu1 %324  ;;  %v2403_v34 = vld [vmem:[%s3330_s5 + $0x48] sm:$0xff]  }
  0xef   :  { %v425_v49 = vmul.f32 %v2768_v53, %v325_v45  ;;  %2118 = vmatmul.mubr.msk.bf16.gmra.mxu0 %vm822_vm0, %v750_v27  ;;  %2185 = vmatprep.subr.bf16.mxu1 %v2403_v34 }
  0xf0   :  { %953 = vmatprep.mubr.bf16.mxu0 %v2493_v3  ;;  %2186 = vmatpush3.bf16.msra.mxu1 %v2404_v60 }
  0xf1   :  { %v457_v57 = vadd.f32 %v425_v49, %v261_v56  ;;  %2187 = vmatprep.subr.bf16.mxu1 %v2405_v30 }
  0xf2   :  { %2360 = vset.pattern.permute.xlu1 %v2493_v3  ;;  %v329_v42 = vpop.permute.xlu1 %328 }
  0xf3   :  { %209 = vperm.xlu1 %2360, %v2731_v38   ;;  %v426_v62 = vmul.f32 %v2768_v53, %v329_v42  ;;  %v653_v0 = vadd.f32 %v621_v59, %v457_v57 }
  0xf4   :  { %2188 = vmatpush3.bf16.msra.mxu1 %v2406_v4 }
  0xf5   :  { %v458_v7 = vadd.f32 %v426_v62, %v262_v61  ;;  %v692_v63 = vadd.f32 %v2790_v6, %v653_v0 }
  0xf7   :  { %2361 = vset.pattern.permute.xlu1 %v2492_v2  ;;  %v525_v31 = vpop.permute.xlu1 %524  ;;  %v724_v12 = vmax.f32 %v692_v63, 0.0 }
  0xf8   :  { %v622_v8 = vmul.f32 %v2775_v55, %v525_v31  ;;  %380 = vperm.xlu1 %2361, %v2731_v38   ;;  %v529_v38 = vpop.permute.xlu0 %528 }
  0xf9   :  { %v623_v19 = vmul.f32 %v2775_v55, %v529_v38 }
  0xfa   :  { %v654_v33 = vadd.f32 %v622_v8, %v458_v7 }
  0xfc   :  { %v693_v9 = vadd.f32 %v2790_v6, %v654_v33  ;;  %384 = vperm.xlu1 %2361, %v2710_v35   ;;  %v150_v11 = vpop.permute.xlu1 %149  ;;  %v537_v45 = vpop.permute.xlu0 %536 }
  0xfd   :  { %v263_v16 = vmul.f32 %v2772_v54, %v150_v11  ;;  %v625_v28 = vmul.f32 %v2775_v55, %v537_v45 }
  0xfe   :  { %v725_v13 = vmax.f32 %v693_v9, 0.0 }
 0x100   :  { %v751_v50 = vpack.c.bf16 %v725_v13, %v724_v12  ;;  %2362 = vset.pattern.permute.xlu1 %v2491_v1  ;;  %v545_v34 = vpop.permute.xlu0 %544 }
 0x101   :  { %580 = vperm.xlu1 %2362, %v2710_v35   ;;  %v333_v14 = vpop.permute.xlu1 %332  ;;  %v264_v35 = vmul.f32 %v2772_v54, %v2842_v10  ;;  %v627_v12 = vmul.f32 %v2775_v55, %v545_v34 }
 0x102   :  { %v427_v15 = vmul.f32 %v2768_v53, %v333_v14  ;;  %2119 = vmatmul.mubr.msk.bf16.gmra.mxu0 %vm822_vm0, %v751_v50 }
 0x103   :  { %963 = vmatprep.mubr.bf16.mxu0 %v2493_v3 }
 0x104   :  { %v459_v18 = vadd.f32 %v427_v15, %v263_v16  ;;  %v553_v62 = vpop.permute.xlu0 %552 }
 0x105   :  { %2363 = vset.pattern.permute.xlu1 %v2493_v3  ;;  %v337_v20 = vpop.permute.xlu1 %336 }
 0x106   :  { %219 = vperm.xlu1 %2363, %v2738_v39   ;;  %v428_v51 = vmul.f32 %v2768_v53, %v337_v20  ;;  %v655_v21 = vadd.f32 %v623_v19, %v459_v18 }
 0x108   :  { %v460_v22 = vadd.f32 %v428_v51, %v264_v35  ;;  %v694_v24 = vadd.f32 %v2790_v6, %v655_v21  ;;  %v2989_v8 = vpop.permute.xlu0 %560 }
 0x10a   :  { %2365 = vset.pattern.permute.xlu1 %v2492_v2  ;;  %v533_v29 = vpop.permute.xlu1 %532  ;;  %v726_v10 = vmax.f32 %v694_v24, 0.0 }
 0x10b   :  { %v624_v23 = vmul.f32 %v2775_v55, %v533_v29  ;;  %388 = vperm.xlu1 %2365, %v2738_v39  }
 0x10c   :  { %v175_v11 = vpop.permute.xlu0 %174 }
 0x10d   :  { %v656_v37 = vadd.f32 %v624_v23, %v460_v22 }
 0x10f   :  { %v695_v25 = vadd.f32 %v2790_v6, %v656_v37  ;;  %392 = vperm.xlu1 %2365, %v2716_v36   ;;  %v160_v26 = vpop.permute.xlu1 %159 }
 0x110   :  { %v265_v39 = vmul.f32 %v2772_v54, %v160_v26  ;;  %v185_v37 = vpop.permute.xlu0 %184 }
 0x111   :  { %v727_v32 = vmax.f32 %v695_v25, 0.0  ;;  %v629_v25 = vmul.f32 %v2775_v55, %v553_v62 }
 0x113   :  { %v752_v27 = vpack.c.bf16 %v727_v32, %v726_v10  ;;  %2366 = vset.pattern.permute.xlu1 %v2491_v1 }
 0x114   :  { %588 = vperm.xlu1 %2366, %v2716_v36   ;;  %v341_v41 = vpop.permute.xlu1 %340  ;;  %v266_v36 = vmul.f32 %v2772_v54, %v2850_v17 }
 0x115   :  { %v429_v48 = vmul.f32 %v2768_v53, %v341_v41  ;;  %2120 = vmatmul.mubr.msk.bf16.gmra.mxu0 %vm822_vm0, %v752_v27 }
 0x116   :  { %973 = vmatprep.mubr.bf16.mxu0 %v2493_v3 }
 0x117   :  { %v461_v49 = vadd.f32 %v429_v48, %v265_v39 }
 0x118   :  { %2367 = vset.pattern.permute.xlu1 %v2493_v3  ;;  %v345_v56 = vpop.permute.xlu1 %344 }
 0x119   :  { %229 = vperm.xlu1 %2367, %v2765_v52   ;;  %v430_v57 = vmul.f32 %v2768_v53, %v345_v56  ;;  %v657_v59 = vadd.f32 %v625_v28, %v461_v49  ;;  %v195_v56 = vpop.permute.xlu0 %194 }
 0x11b   :  { %v462_v60 = vadd.f32 %v430_v57, %v266_v36  ;;  %v696_v30 = vadd.f32 %v2790_v6, %v657_v59 }
 0x11d   :  { %2368 = vset.pattern.permute.xlu1 %v2492_v2  ;;  %v541_v42 = vpop.permute.xlu1 %540  ;;  %v728_v31 = vmax.f32 %v696_v30, 0.0 }
 0x11e   :  { %v626_v61 = vmul.f32 %v2775_v55, %v541_v42  ;;  %396 = vperm.xlu1 %2368, %v2765_v52  }
 0x120   :  { %v658_v0 = vadd.f32 %v626_v61, %v462_v60  ;;  %v205_v60 = vpop.permute.xlu0 %204  ;;  %v631_v61 = vmul.f32 %v2775_v55, %v2989_v8 }
 0x122   :  { %v697_v4 = vadd.f32 %v2790_v6, %v658_v0  ;;  %400 = vperm.xlu1 %2368, %v2788_v5   ;;  %v170_v17 = vpop.permute.xlu1 %169  ;;  %v272_v0 = vmul.f32 %v2772_v54, %v195_v56 }
 0x123   :  { %v267_v9 = vmul.f32 %v2772_v54, %v170_v17 }
 0x124   :  { %v729_v7 = vmax.f32 %v697_v4, 0.0 }
 0x126   :  { %v753_v63 = vpack.c.bf16 %v729_v7, %v728_v31  ;;  %2370 = vset.pattern.permute.xlu1 %v2491_v1  ;;  %v215_v31 = vpop.permute.xlu0 %214 }
 0x127   :  { %596 = vperm.xlu1 %2370, %v2788_v5   ;;  %v349_v33 = vpop.permute.xlu1 %348  ;;  %v268_v5 = vmul.f32 %v2772_v54, %v175_v11 }
 0x128   :  { %v431_v52 = vmul.f32 %v2768_v53, %v349_v33  ;;  %2121 = vmatmul.mubr.msk.bf16.gmra.mxu0 %vm822_vm0, %v753_v63 }
 0x129   :  { %983 = vmatprep.mubr.bf16.mxu0 %v2493_v3 }
 0x12a   :  { %v463_v13 = vadd.f32 %v431_v52, %v267_v9 }
 0x12b   :  { %2371 = vset.pattern.permute.xlu1 %v2493_v3  ;;  %v353_v50 = vpop.permute.xlu1 %352 }
 0x12c   :  { %239 = vperm.xlu1 %2371, %v2823_v58   ;;  %v432_v14 = vmul.f32 %v2768_v53, %v353_v50  ;;  %v659_v15 = vadd.f32 %v627_v12, %v463_v13  ;;  %v3032_v13 = vpop.permute.xlu0 %224 }
 0x12e   :  { %v464_v16 = vadd.f32 %v432_v14, %v268_v5  ;;  %v698_v19 = vadd.f32 %v2790_v6, %v659_v15 }
 0x130   :  { %2372 = vset.pattern.permute.xlu1 %v2492_v2  ;;  %v549_v38 = vpop.permute.xlu1 %548  ;;  %v730_v21 = vmax.f32 %v698_v19, 0.0 }
 0x131   :  { %v628_v18 = vmul.f32 %v2775_v55, %v549_v38  ;;  %404 = vperm.xlu1 %2372, %v2823_v58   ;;  %v569_v38 = vpop.permute.xlu0 %568 }
 0x132   :  { %v633_v19 = vmul.f32 %v2775_v55, %v569_v38 }
 0x133   :  { %v660_v20 = vadd.f32 %v628_v18, %v464_v16 }
 0x135   :  { %v699_v35 = vadd.f32 %v2790_v6, %v660_v20  ;;  %408 = vperm.xlu1 %2372, %v2811_v44   ;;  %v180_v51 = vpop.permute.xlu1 %179 }
 0x136   :  { %v269_v58 = vmul.f32 %v2772_v54, %v180_v51 }
 0x137   :  { %v731_v29 = vmax.f32 %v699_v35, 0.0  ;;  %v274_v35 = vmul.f32 %v2772_v54, %v205_v60 }
 0x139   :  { %v754_v22 = vpack.c.bf16 %v731_v29, %v730_v21  ;;  %2374 = vset.pattern.permute.xlu1 %v2491_v1  ;;  %v270_v1 = vmul.f32 %v2772_v54, %v185_v37  ;;  %v770_v37 = vld [vmem:[%s3329_s4] sm:$0x3] }
 0x13a   :  { %604 = vperm.xlu1 %2374, %v2811_v44   ;;  %v357_v23 = vpop.permute.xlu1 %356 }
 0x13b   :  { %v433_v24 = vmul.f32 %v2768_v53, %v357_v23  ;;  %2122 = vmatmul.mubr.msk.bf16.gmra.mxu0 %vm822_vm0, %v754_v22 }
 0x13c   :  { %993 = vmatprep.mubr.bf16.mxu0 %v2493_v3 }
 0x13d   :  { %v465_v26 = vadd.f32 %v433_v24, %v269_v58 }
 0x13e   :  { %v361_v10 = vpop.permute.xlu1 %360  ;;  %2375 = vset.pattern.permute.xlu1 %v2492_v2 }
 0x13f   :  { %v434_v44 = vmul.f32 %v2768_v53, %v361_v10  ;;  %v661_v32 = vadd.f32 %v629_v25, %v465_v26 }
 0x141   :  { %v466_v41 = vadd.f32 %v434_v44, %v270_v1  ;;  %v700_v48 = vadd.f32 %v2790_v6, %v661_v32  ;;  %v3048_v1 = vrot.slane %v770_v37, %v2750_v46  ;;  %v3051_v44 = vrot.slane %v770_v37, %v2753_v47 }
 0x143   :  { %v557_v27 = vpop.permute.xlu1 %556  ;;  %v732_v34 = vmax.f32 %v700_v48, 0.0 }
 0x144   :  { %v630_v45 = vmul.f32 %v2775_v55, %v557_v27 }
 0x146   :  { %v662_v39 = vadd.f32 %v630_v45, %v466_v41 }
 0x148   :  { %v701_v49 = vadd.f32 %v2790_v6, %v662_v39  ;;  %v190_v28 = vpop.permute.xlu1 %189 }
 0x149   :  { %v271_v42 = vmul.f32 %v2772_v54, %v190_v28 }
 0x14a   :  { %v733_v36 = vmax.f32 %v701_v49, 0.0 }
 0x14c   :  { %v755_v57 = vpack.c.bf16 %v733_v36, %v732_v34 }
 0x14d   :  { %v365_v2 = vpop.permute.xlu1 %364 }
 0x14e   :  { %v435_v59 = vmul.f32 %v2768_v53, %v365_v2  ;;  %2123 = vmatmul.mubr.msk.bf16.gmra.mxu0 %vm822_vm0, %v755_v57  ;;  %v577_v2 = vpop.permute.xlu0 %576 }
 0x14f   :  { %1003 = vmatprep.mubr.bf16.mxu0 %v2493_v3 }
 0x150   :  { %v467_v62 = vadd.f32 %v435_v59, %v271_v42 }
 0x151   :  { %v369_v30 = vpop.permute.xlu1 %368 }
 0x152   :  { %v436_v4 = vmul.f32 %v2768_v53, %v369_v30  ;;  %v663_v17 = vadd.f32 %v631_v61, %v467_v62 }
 0x154   :  { %v468_v63 = vadd.f32 %v436_v4, %v272_v0  ;;  %v702_v52 = vadd.f32 %v2790_v6, %v663_v17  ;;  %v635_v4 = vmul.f32 %v2775_v55, %v577_v2 }
 0x156   :  { %v565_v7 = vpop.permute.xlu1 %564  ;;  %v734_v8 = vmax.f32 %v702_v52, 0.0 }
 0x157   :  { %v632_v33 = vmul.f32 %v2775_v55, %v565_v7 }
 0x159   :  { %v664_v9 = vadd.f32 %v632_v33, %v468_v63  ;;  %v276_v33 = vmul.f32 %v2772_v54, %v215_v31 }
 0x15b   :  { %v703_v11 = vadd.f32 %v2790_v6, %v664_v9  ;;  %v200_v12 = vpop.permute.xlu1 %199 }
 0x15c   :  { %v273_v16 = vmul.f32 %v2772_v54, %v200_v12 }
 0x15d   :  { %v735_v50 = vmax.f32 %v703_v11, 0.0 }
 0x15f   :  { %v756_v5 = vpack.c.bf16 %v735_v50, %v734_v8 }
 0x160   :  { %v373_v14 = vpop.permute.xlu1 %372 }
 0x161   :  { %v437_v15 = vmul.f32 %v2768_v53, %v373_v14  ;;  %2124 = vmatmul.mubr.msk.bf16.gmra.mxu0 %vm822_vm0, %v756_v5 }
 0x162   :  { %1013 = vmatprep.mubr.bf16.mxu0 %v2493_v3 }
 0x163   :  { %v469_v18 = vadd.f32 %v437_v15, %v273_v16 }
 0x164   :  { %v377_v20 = vpop.permute.xlu1 %376 }
 0x165   :  { %v438_v51 = vmul.f32 %v2768_v53, %v377_v20  ;;  %v665_v21 = vadd.f32 %v633_v19, %v469_v18 }
 0x167   :  { %v470_v22 = vadd.f32 %v438_v51, %v274_v35  ;;  %v704_v24 = vadd.f32 %v2790_v6, %v665_v21 }
 0x169   :  { %v573_v29 = vpop.permute.xlu1 %572  ;;  %v736_v27 = vmax.f32 %v704_v24, 0.0 }
 0x16a   :  { %v634_v23 = vmul.f32 %v2775_v55, %v573_v29 }
 0x16c   :  { %v666_v58 = vadd.f32 %v634_v23, %v470_v22  ;;  %v905_v25 = vpop.f32.mrf.mxu0 }
 0x16d   :  { %v906_v28 = vadd.f32 %v905_v25, %v3051_v44 }
 0x16e   :  { %v705_v26 = vadd.f32 %v2790_v6, %v666_v58  ;;  %v210_v10 = vpop.permute.xlu1 %209  ;;  %v907_v32 = vpop.f32.mrf.mxu0 }
 0x16f   :  { %v908_v39 = vadd.f32 %v907_v32, %v3048_v1  ;;  %v275_v59 = vmul.f32 %v2772_v54, %v210_v10  ;;  %v1064_v30 = vmax.f32 %v906_v28, 0.0  ;;  %v585_v32 = vpop.permute.xlu0 %584 }
 0x170   :  { %v737_v41 = vmax.f32 %v705_v26, 0.0  ;;  %v909_v45 = vpop.f32.mrf.mxu0 }
 0x171   :  { %v910_v49 = vadd.f32 %v909_v45, %v3051_v44  ;;  %v1065_v60 = vmax.f32 %v908_v39, 0.0 }
 0x172   :  { %v757_v48 = vpack.c.bf16 %v737_v41, %v736_v27  ;;  %v911_v56 = vpop.f32.mrf.mxu0 }
 0x173   :  { %v381_v34 = vpop.permute.xlu1 %380  ;;  %v912_v36 = vadd.f32 %v911_v56, %v3048_v1  ;;  %v1066_v42 = vmax.f32 %v910_v49, 0.0 }
 0x174   :  { %v439_v57 = vmul.f32 %v2768_v53, %v381_v34  ;;  %2125 = vmatmul.mubr.msk.bf16.gmra.mxu0 %vm822_vm0, %v757_v48  ;;  %v637_v48 = vmul.f32 %v2775_v55, %v585_v32  ;;  %v278_v34 = vmul.f32 %v2772_v54, %v3032_v13 }
 0x175   :  { %1023 = vmatprep.mubr.bf16.mxu0 %v2493_v3  ;;  %v1067_v61 = vmax.f32 %v912_v36, 0.0  ;;  %v1128_v52 = vpack.c.bf16 %v1066_v42, %v1064_v30 }
 0x176   :  { %v915_v62 = vpop.f32.mrf.mxu0  ;;  %v471_v0 = vadd.f32 %v439_v57, %v275_v59 }
 0x177   :  { %v385_v17 = vpop.permute.xlu1 %384  ;;  %v1129_v63 = vpack.c.bf16 %v1067_v61, %v1065_v60  ;;  %v916_v5 = vadd.f32 %v915_v62, %v3051_v44 }
 0x178   :  { %v917_v7 = vpop.f32.mrf.mxu0  ;;  %v440_v9 = vmul.f32 %v2768_v53, %v385_v17  ;;  %v667_v12 = vadd.f32 %v635_v4, %v471_v0 }
 0x179   :  { %1327 = vmatprep.mubr.bf16.mxu1 %v1129_v63  ;;  %v918_v8 = vadd.f32 %v917_v7, %v3048_v1  ;;  %v1068_v21 = vmax.f32 %v916_v5, 0.0  ;;  %v593_v5 = vpop.permute.xlu0 %592 }
 0x17a   :  { %v919_v11 = vpop.f32.mrf.mxu0  ;;  %1328 = vmatmul.mubr.bf16.vlgmr.msra.gmra.mxu1 %v1128_v52  ;;  %v472_v38 = vadd.f32 %v440_v9, %v276_v33  ;;  %v706_v19 = vadd.f32 %v2790_v6, %v667_v12 }
 0x17b   :  { %v920_v50 = vadd.f32 %v919_v11, %v3051_v44  ;;  %v1069_v20 = vmax.f32 %v918_v8, 0.0 }
 0x17c   :  { %v921_v14 = vpop.f32.mrf.mxu0  ;;  %v581_v15 = vpop.permute.xlu1 %580  ;;  %v738_v58 = vmax.f32 %v706_v19, 0.0 }
 0x17d   :  { %v922_v16 = vadd.f32 %v921_v14, %v3048_v1  ;;  %v636_v31 = vmul.f32 %v2775_v55, %v581_v15  ;;  %v1070_v18 = vmax.f32 %v920_v50, 0.0 }
 0x17f   :  { %v1071_v35 = vmax.f32 %v922_v16, 0.0  ;;  %v668_v51 = vadd.f32 %v636_v31, %v472_v38  ;;  %v1130_v24 = vpack.c.bf16 %v1070_v18, %v1068_v21  ;;  %v235_v31 = vpop.permute.xlu0 %234 }
 0x181   :  { %v1131_v29 = vpack.c.bf16 %v1071_v35, %v1069_v20  ;;  %v707_v22 = vadd.f32 %v2790_v6, %v668_v51  ;;  %v220_v23 = vpop.permute.xlu1 %219  ;;  %v639_v35 = vmul.f32 %v2775_v55, %v593_v5  ;;  %v280_v51 = vmul.f32 %v2772_v54, %v235_v31 }
 0x182   :  { %v277_v27 = vmul.f32 %v2772_v54, %v220_v23 }
 0x183   :  { %v739_v37 = vmax.f32 %v707_v22, 0.0  ;;  %1335 = vmatprep.mubr.bf16.mxu1 %v1131_v29 }
 0x184   :  { %1336 = vmatmul.mubr.bf16.gmra.mxu1 %v1130_v24 }
 0x185   :  { %v758_v25 = vpack.c.bf16 %v739_v37, %v738_v58 }
 0x186   :  { %v389_v26 = vpop.permute.xlu1 %388 }
 0x187   :  { %v441_v10 = vmul.f32 %v2768_v53, %v389_v26  ;;  %2126 = vmatmul.mubr.msk.bf16.gmra.mxu0 %vm822_vm0, %v758_v25 }
 0x188   :  { %1033 = vmatprep.mubr.bf16.mxu0 %v2493_v3 }
 0x189   :  { %v925_v41 = vpop.f32.mrf.mxu0  ;;  %v473_v45 = vadd.f32 %v441_v10, %v277_v27 }
 0x18a   :  { %v393_v39 = vpop.permute.xlu1 %392  ;;  %v926_v59 = vadd.f32 %v925_v41, %v3051_v44 }
 0x18b   :  { %v927_v49 = vpop.f32.mrf.mxu0  ;;  %v442_v28 = vmul.f32 %v2768_v53, %v393_v39  ;;  %v669_v36 = vadd.f32 %v637_v48, %v473_v45 }
 0x18c   :  { %v928_v57 = vadd.f32 %v927_v49, %v3048_v1  ;;  %v1072_v63 = vmax.f32 %v926_v59, 0.0 }
 0x18d   :  { %v929_v56 = vpop.f32.mrf.mxu0  ;;  %v474_v61 = vadd.f32 %v442_v28, %v278_v34  ;;  %v708_v4 = vadd.f32 %v2790_v6, %v669_v36  ;;  %v245_v36 = vpop.permute.xlu0 %244 }
 0x18e   :  { %v930_v2 = vadd.f32 %v929_v56, %v3051_v44  ;;  %v1073_v17 = vmax.f32 %v928_v57, 0.0 }
 0x18f   :  { %v931_v42 = vpop.f32.mrf.mxu0  ;;  %v589_v60 = vpop.permute.xlu1 %588  ;;  %v740_v12 = vmax.f32 %v708_v4, 0.0 }
 0x190   :  { %v932_v62 = vadd.f32 %v931_v42, %v3048_v1  ;;  %v638_v30 = vmul.f32 %v2775_v55, %v589_v60  ;;  %v1074_v0 = vmax.f32 %v930_v2, 0.0 }
 0x192   :  { %v1075_v7 = vmax.f32 %v932_v62, 0.0  ;;  %v670_v13 = vadd.f32 %v638_v30, %v474_v61  ;;  %v1132_v11 = vpack.c.bf16 %v1074_v0, %v1072_v63  ;;  %v601_v62 = vpop.permute.xlu0 %600 }
 0x193   :  { %v641_v4 = vmul.f32 %v2775_v55, %v601_v62 }
 0x194   :  { %v1133_v33 = vpack.c.bf16 %v1075_v7, %v1073_v17  ;;  %v709_v52 = vadd.f32 %v2790_v6, %v670_v13  ;;  %v230_v9 = vpop.permute.xlu1 %229 }
 0x195   :  { %v279_v38 = vmul.f32 %v2772_v54, %v230_v9 }
 0x196   :  { %v741_v8 = vmax.f32 %v709_v52, 0.0  ;;  %1343 = vmatprep.mubr.bf16.mxu1 %v1133_v33  ;;  %v282_v33 = vmul.f32 %v2772_v54, %v245_v36 }
 0x197   :  { %1344 = vmatmul.mubr.bf16.gmra.mxu1 %v1132_v11 }
 0x198   :  { %v759_v50 = vpack.c.bf16 %v741_v8, %v740_v12 }
 0x199   :  { %v397_v14 = vpop.permute.xlu1 %396 }
 0x19a   :  { %v443_v15 = vmul.f32 %v2768_v53, %v397_v14  ;;  %2127 = vmatmul.mubr.msk.bf16.gmra.mxu0 %vm822_vm0, %v759_v50 }
 0x19b   :  { %1043 = vmatprep.mubr.bf16.mxu0 %v2493_v3 }
 0x19c   :  { %v935_v16 = vpop.f32.mrf.mxu0  ;;  %v475_v18 = vadd.f32 %v443_v15, %v279_v38 }
 0x19d   :  { %v401_v19 = vpop.permute.xlu1 %400  ;;  %v936_v58 = vadd.f32 %v935_v16, %v3051_v44  ;;  %v2445_v16 = vld [vmem:[#allocation3] ss:$0 sm:$0xff] }
 0x19e   :  { %v937_v20 = vpop.f32.mrf.mxu0  ;;  %v444_v21 = vmul.f32 %v2768_v53, %v401_v19  ;;  %v671_v22 = vadd.f32 %v639_v35, %v475_v18 }
 0x19f   :  { %v938_v23 = vadd.f32 %v937_v20, %v3048_v1  ;;  %v1076_v49 = vmax.f32 %v936_v58, 0.0 }
 0x1a0   :  { %v939_v29 = vpop.f32.mrf.mxu0  ;;  %v476_v26 = vadd.f32 %v444_v21, %v280_v51  ;;  %v710_v41 = vadd.f32 %v2790_v6, %v671_v22 }
 0x1a1   :  { %v940_v24 = vadd.f32 %v939_v29, %v3051_v44  ;;  %v1077_v45 = vmax.f32 %v938_v23, 0.0 }
 0x1a2   :  { %v941_v37 = vpop.f32.mrf.mxu0  ;;  %v597_v25 = vpop.permute.xlu1 %596  ;;  %v742_v2 = vmax.f32 %v710_v41, 0.0 }
 0x1a3   :  { %v942_v10 = vadd.f32 %v941_v37, %v3048_v1  ;;  %v640_v32 = vmul.f32 %v2775_v55, %v597_v25  ;;  %v1078_v27 = vmax.f32 %v940_v24, 0.0 }
 0x1a5   :  { %v1079_v48 = vmax.f32 %v942_v10, 0.0  ;;  %v672_v39 = vadd.f32 %v640_v32, %v476_v26  ;;  %v1134_v57 = vpack.c.bf16 %v1078_v27, %v1076_v49 }
 0x1a7   :  { %v1135_v28 = vpack.c.bf16 %v1079_v48, %v1077_v45  ;;  %v711_v56 = vadd.f32 %v2790_v6, %v672_v39  ;;  %v240_v34 = vpop.permute.xlu1 %239 }
 0x1a8   :  { %v281_v30 = vmul.f32 %v2772_v54, %v240_v34 }
 0x1a9   :  { %v743_v59 = vmax.f32 %v711_v56, 0.0  ;;  %1351 = vmatprep.mubr.bf16.mxu1 %v1135_v28 }
 0x1aa   :  { %1352 = vmatmul.mubr.bf16.gmra.mxu1 %v1134_v57 }
 0x1ab   :  { %v760_v42 = vpack.c.bf16 %v743_v59, %v742_v2 }
 0x1ac   :  { %v405_v60 = vpop.permute.xlu1 %404 }
 0x1ad   :  { %v445_v61 = vmul.f32 %v2768_v53, %v405_v60  ;;  %2128 = vmatmul.mubr.msk.bf16.gmra.mxu0 %vm822_vm0, %v760_v42 }
 0x1ae   :  { %1053 = vmatprep.mubr.bf16.mxu0 %v2493_v3 }
 0x1af   :  { %v945_v0 = vpop.f32.mrf.mxu0  ;;  %v477_v6 = vadd.f32 %v445_v61, %v281_v30 }
 0x1b0   :  { %v409_v17 = vpop.permute.xlu1 %408  ;;  %v946_v12 = vadd.f32 %v945_v0, %v3051_v44 }
 0x1b1   :  { %v947_v7 = vpop.f32.mrf.mxu0  ;;  %v446_v13 = vmul.f32 %v2768_v53, %v409_v17  ;;  %v673_v52 = vadd.f32 %v641_v4, %v477_v6 }
 0x1b2   :  { %v948_v9 = vadd.f32 %v947_v7, %v3048_v1  ;;  %v1080_v19 = vmax.f32 %v946_v12, 0.0 }
 0x1b3   :  { %v949_v63 = vpop.f32.mrf.mxu0  ;;  %v478_v5 = vadd.f32 %v446_v13, %v282_v33  ;;  %v712_v53 = vadd.f32 %v2445_v16, %v673_v52 }
 0x1b4   :  { %v950_v11 = vadd.f32 %v949_v63, %v3051_v44  ;;  %v1081_v31 = vmax.f32 %v948_v9, 0.0 }
 0x1b5   :  { %v951_v8 = vpop.f32.mrf.mxu0  ;;  %v605_v50 = vpop.permute.xlu1 %604  ;;  %v744_v21 = vmax.f32 %v712_v53, 0.0 }
 0x1b6   :  { %v952_v14 = vadd.f32 %v951_v8, %v3048_v1  ;;  %v642_v15 = vmul.f32 %v2775_v55, %v605_v50  ;;  %v1082_v38 = vmax.f32 %v950_v11, 0.0 }
 0x1b8   :  { %v1083_v18 = vmax.f32 %v952_v14, 0.0  ;;  %v674_v54 = vadd.f32 %v642_v15, %v478_v5  ;;  %v1136_v51 = vpack.c.bf16 %v1082_v38, %v1080_v19 }
 0x1ba   :  { %v1137_v20 = vpack.c.bf16 %v1083_v18, %v1081_v31  ;;  %v713_v35 = vadd.f32 %v2445_v16, %v674_v54 }
 0x1bc   :  { %v745_v29 = vmax.f32 %v713_v35, 0.0  ;;  %1359 = vmatprep.mubr.bf16.mxu1 %v1137_v20 }
 0x1bd   :  { %1360 = vmatmul.mubr.bf16.gmra.mxu1 %v1136_v51 }
 0x1be   :  { %v761_v22 = vpack.c.bf16 %v745_v29, %v744_v21 }
 0x1c0   :  { %2129 = vmatmul.mubr.msk.bf16.gmra.mxu0 %vm822_vm0, %v761_v22 }
 0x1c1   :  { %1799 = vmatprep.mubr.bf16.mxu0 %v2493_v3 }
 0x1c2   :  { %v955_v55 = vpop.f32.mrf.mxu0 }
 0x1c3   :  { %v956_v25 = vadd.f32 %v955_v55, %v3051_v44 }
 0x1c4   :  { %v957_v23 = vpop.f32.mrf.mxu0 }
 0x1c5   :  { %v958_v58 = vadd.f32 %v957_v23, %v3048_v1  ;;  %v1084_v45 = vmax.f32 %v956_v25, 0.0 }
 0x1c6   :  { %v959_v24 = vpop.f32.mrf.mxu0 }
 0x1c7   :  { %v960_v37 = vadd.f32 %v959_v24, %v3051_v44  ;;  %v1085_v27 = vmax.f32 %v958_v58, 0.0 }
 0x1c8   :  { %v961_v26 = vpop.f32.mrf.mxu0 }
 0x1c9   :  { %v962_v10 = vadd.f32 %v961_v26, %v3048_v1  ;;  %v1086_v32 = vmax.f32 %v960_v37, 0.0 }
 0x1cb   :  { %v1087_v41 = vmax.f32 %v962_v10, 0.0  ;;  %v1138_v39 = vpack.c.bf16 %v1086_v32, %v1084_v45 }
 0x1cd   :  { %v1139_v48 = vpack.c.bf16 %v1087_v41, %v1085_v27 }
 0x1cf   :  { %1367 = vmatprep.mubr.bf16.mxu1 %v1139_v48 }
 0x1d0   :  { %1368 = vmatmul.mubr.bf16.gmra.mxu1 %v1138_v39 }
 0x1d5   :  { %v965_v49 = vpop.f32.mrf.mxu0 }
 0x1d6   :  { %v966_v57 = vadd.f32 %v965_v49, %v3051_v44 }
 0x1d7   :  { %v967_v28 = vpop.f32.mrf.mxu0 }
 0x1d8   :  { %v968_v34 = vadd.f32 %v967_v28, %v3048_v1  ;;  %v1088_v62 = vmax.f32 %v966_v57, 0.0 }
 0x1d9   :  { %v969_v56 = vpop.f32.mrf.mxu0 }
 0x1da   :  { %v970_v36 = vadd.f32 %v969_v56, %v3051_v44  ;;  %v1089_v60 = vmax.f32 %v968_v34, 0.0 }
 0x1db   :  { %v971_v2 = vpop.f32.mrf.mxu0 }
 0x1dc   :  { %v972_v59 = vadd.f32 %v971_v2, %v3048_v1  ;;  %v1090_v42 = vmax.f32 %v970_v36, 0.0 }
 0x1de   :  { %v1091_v61 = vmax.f32 %v972_v59, 0.0  ;;  %v1140_v0 = vpack.c.bf16 %v1090_v42, %v1088_v62 }
 0x1e0   :  { %v1141_v30 = vpack.c.bf16 %v1091_v61, %v1089_v60 }
 0x1e2   :  { %1375 = vmatprep.mubr.bf16.mxu1 %v1141_v30 }
 0x1e3   :  { %1376 = vmatmul.mubr.bf16.gmra.mxu1 %v1140_v0 }
 0x1e8   :  { %v975_v6 = vpop.f32.mrf.mxu0 }
 0x1e9   :  { %v976_v63 = vadd.f32 %v975_v6, %v3051_v44 }
 0x1ea   :  { %v977_v4 = vpop.f32.mrf.mxu0 }
 0x1eb   :  { %v978_v7 = vadd.f32 %v977_v4, %v3048_v1  ;;  %v1092_v8 = vmax.f32 %v976_v63, 0.0 }
 0x1ec   :  { %v979_v17 = vpop.f32.mrf.mxu0 }
 0x1ed   :  { %v980_v13 = vadd.f32 %v979_v17, %v3051_v44  ;;  %v1093_v11 = vmax.f32 %v978_v7, 0.0 }
 0x1ee   :  { %v981_v33 = vpop.f32.mrf.mxu0 }
 0x1ef   :  { %v982_v52 = vadd.f32 %v981_v33, %v3048_v1  ;;  %v1094_v9 = vmax.f32 %v980_v13, 0.0 }
 0x1f1   :  { %v1095_v12 = vmax.f32 %v982_v52, 0.0  ;;  %v1142_v5 = vpack.c.bf16 %v1094_v9, %v1092_v8 }
 0x1f3   :  { %v1143_v50 = vpack.c.bf16 %v1095_v12, %v1093_v11 }
 0x1f5   :  { %1383 = vmatprep.mubr.bf16.mxu1 %v1143_v50 }
 0x1f6   :  { %1384 = vmatmul.mubr.bf16.gmra.mxu1 %v1142_v5 }
 0x1fb   :  { %v985_v14 = vpop.f32.mrf.mxu0 }
 0x1fc   :  { %v986_v31 = vadd.f32 %v985_v14, %v3051_v44 }
 0x1fd   :  { %v987_v15 = vpop.f32.mrf.mxu0 }
 0x1fe   :  { %v988_v16 = vadd.f32 %v987_v15, %v3048_v1  ;;  %v1096_v51 = vmax.f32 %v986_v31, 0.0  ;;  %v3145_v15 = vld [vmem:[%s3331_s6] ss:$0 sm:$0xff] }
 0x1ff   :  { %v989_v38 = vpop.f32.mrf.mxu0 }
 0x200   :  { %v990_v53 = vadd.f32 %v989_v38, %v3051_v44  ;;  %v1097_v20 = vmax.f32 %v988_v16, 0.0 }
 0x201   :  { %v991_v18 = vpop.f32.mrf.mxu0 }
 0x202   :  { %v992_v54 = vadd.f32 %v991_v18, %v3048_v1  ;;  %v1098_v19 = vmax.f32 %v990_v53, 0.0 }
 0x204   :  { %v1099_v35 = vmax.f32 %v992_v54, 0.0  ;;  %v1144_v29 = vpack.c.bf16 %v1098_v19, %v1096_v51 }
 0x206   :  { %v1145_v21 = vpack.c.bf16 %v1099_v35, %v1097_v20 }
 0x208   :  { %1391 = vmatprep.mubr.bf16.mxu1 %v1145_v21 }
 0x209   :  { %1392 = vmatmul.mubr.bf16.gmra.mxu1 %v1144_v29 }
 0x20e   :  { %v995_v22 = vpop.f32.mrf.mxu0 }
 0x20f   :  { %v996_v37 = vadd.f32 %v995_v22, %v3051_v44 }
 0x210   :  { %v997_v55 = vpop.f32.mrf.mxu0 }
 0x211   :  { %v998_v24 = vadd.f32 %v997_v55, %v3048_v1  ;;  %v1100_v41 = vmax.f32 %v996_v37, 0.0 }
 0x212   :  { %v999_v23 = vpop.f32.mrf.mxu0 }
 0x213   :  { %v1000_v58 = vadd.f32 %v999_v23, %v3051_v44  ;;  %v1101_v32 = vmax.f32 %v998_v24, 0.0 }
 0x214   :  { %v1001_v25 = vpop.f32.mrf.mxu0 }
 0x215   :  { %v1002_v26 = vadd.f32 %v1001_v25, %v3048_v1  ;;  %v1102_v10 = vmax.f32 %v1000_v58, 0.0 }
 0x217   :  { %v1103_v27 = vmax.f32 %v1002_v26, 0.0  ;;  %v1146_v48 = vpack.c.bf16 %v1102_v10, %v1100_v41 }
 0x219   :  { %v1147_v45 = vpack.c.bf16 %v1103_v27, %v1101_v32 }
 0x21b   :  { %1399 = vmatprep.mubr.bf16.mxu1 %v1147_v45 }
 0x21c   :  { %1400 = vmatmul.mubr.bf16.gmra.mxu1 %v1146_v48 }
 0x221   :  { %v1005_v39 = vpop.f32.mrf.mxu0 }
 0x222   :  { %v1006_v36 = vadd.f32 %v1005_v39, %v3051_v44 }
 0x223   :  { %v1007_v49 = vpop.f32.mrf.mxu0 }
 0x224   :  { %v1008_v56 = vadd.f32 %v1007_v49, %v3048_v1  ;;  %v1104_v61 = vmax.f32 %v1006_v36, 0.0 }
 0x225   :  { %v1009_v28 = vpop.f32.mrf.mxu0 }
 0x226   :  { %v1010_v34 = vadd.f32 %v1009_v28, %v3051_v44  ;;  %v1105_v42 = vmax.f32 %v1008_v56, 0.0 }
 0x227   :  { %v1011_v57 = vpop.f32.mrf.mxu0 }
 0x228   :  { %v1012_v2 = vadd.f32 %v1011_v57, %v3048_v1  ;;  %v1106_v59 = vmax.f32 %v1010_v34, 0.0 }
 0x22a   :  { %v1107_v60 = vmax.f32 %v1012_v2, 0.0  ;;  %v1148_v30 = vpack.c.bf16 %v1106_v59, %v1104_v61 }
 0x22c   :  { %v1149_v62 = vpack.c.bf16 %v1107_v60, %v1105_v42 }
 0x22e   :  { %1407 = vmatprep.mubr.bf16.mxu1 %v1149_v62 }
 0x22f   :  { %1408 = vmatmul.mubr.bf16.gmra.mxu1 %v1148_v30 }
 0x234   :  { %v1015_v0 = vpop.f32.mrf.mxu0 }
 0x235   :  { %v1016_v13 = vadd.f32 %v1015_v0, %v3051_v44 }
 0x236   :  { %v1017_v6 = vpop.f32.mrf.mxu0 }
 0x237   :  { %v1018_v17 = vadd.f32 %v1017_v6, %v3048_v1  ;;  %v1108_v50 = vmax.f32 %v1016_v13, 0.0 }
 0x238   :  { %v1019_v4 = vpop.f32.mrf.mxu0 }
 0x239   :  { %v1020_v7 = vadd.f32 %v1019_v4, %v3051_v44  ;;  %v1109_v11 = vmax.f32 %v1018_v17, 0.0 }
 0x23a   :  { %v1021_v63 = vpop.f32.mrf.mxu0  ;;  %v2189_v52 = vpop.f32.mrf.mxu1 }
 0x23b   :  { %v1022_v33 = vadd.f32 %v1021_v63, %v3048_v1  ;;  %v1110_v9 = vmax.f32 %v1020_v7, 0.0 }
 0x23c   :  { %v2190_v8 = vpop.f32.mrf.mxu1 }
 0x23d   :  { %v1111_v12 = vmax.f32 %v1022_v33, 0.0  ;;  %v2191_v5 = vadd.f32 %v2190_v8, %v2189_v52  ;;  %v1150_v16 = vpack.c.bf16 %v1110_v9, %v1108_v50 }
 0x23e   :  { %v2192_v38 = vpop.f32.mrf.mxu1 }
 0x23f   :  { %v1151_v14 = vpack.c.bf16 %v1111_v12, %v1109_v11  ;;  %v1330_v31 = vadd.f32 %v2191_v5, %v3145_v15 }
 0x240   :  { %v2193_v53 = vpop.f32.mrf.mxu1 }
 0x241   :  { %1415 = vmatprep.mubr.bf16.mxu1 %v1151_v14  ;;  %v2194_v18 = vadd.f32 %v2193_v53, %v2192_v38  ;;  %v1456_v20 = vmax.f32 %v1330_v31, 0.0 }
 0x242   :  { %1416 = vmatmul.mubr.bf16.gmra.mxu1 %v1150_v16 }
 0x243   :  { %v1333_v54 = vadd.f32 %v2194_v18, %v3145_v15 }
 0x244   :  { %v2195_v19 = vpop.f32.mrf.mxu1 }
 0x245   :  { %v1457_v35 = vmax.f32 %v1333_v54, 0.0 }
 0x246   :  { %v2196_v51 = vpop.f32.mrf.mxu1 }
 0x247   :  { %v2197_v21 = vadd.f32 %v2196_v51, %v2195_v19  ;;  %v1025_v29 = vpop.f32.mrf.mxu0  ;;  %v1488_v22 = vmax.f32 %v1456_v20, %v1457_v35 }
 0x248   :  { %v2198_v55 = vpop.f32.mrf.mxu1  ;;  %v1026_v41 = vadd.f32 %v1025_v29, %v3051_v44 }
 0x249   :  { %v1027_v23 = vpop.f32.mrf.mxu0  ;;  %v1489_v24 = vrot.slane %v1488_v22, 4  ;;  %v1338_v37 = vadd.f32 %v2197_v21, %v3145_v15 }
 0x24a   :  { %v2199_v58 = vpop.f32.mrf.mxu1  ;;  %v1028_v32 = vadd.f32 %v1027_v23, %v3048_v1  ;;  %v1112_v59 = vmax.f32 %v1026_v41, 0.0 }
 0x24b   :  { %v2200_v25 = vadd.f32 %v2199_v58, %v2198_v55  ;;  %v1029_v26 = vpop.f32.mrf.mxu0  ;;  %v1490_v10 = vmax.f32 %v1488_v22, %v1489_v24  ;;  %v1458_v28 = vmax.f32 %v1338_v37, 0.0 }
 0x24c   :  { %v1030_v27 = vadd.f32 %v1029_v26, %v3051_v44  ;;  %v1113_v36 = vmax.f32 %v1028_v32, 0.0 }
 0x24d   :  { %v1341_v45 = vadd.f32 %v2200_v25, %v3145_v15  ;;  %v1031_v48 = vpop.f32.mrf.mxu0  ;;  %v1491_v39 = vrot.slane %v1490_v10, 2 }
 0x24e   :  { %v1032_v49 = vadd.f32 %v1031_v48, %v3048_v1  ;;  %v1114_v34 = vmax.f32 %v1030_v27, 0.0 }
 0x24f   :  { %v1459_v56 = vmax.f32 %v1341_v45, 0.0  ;;  %v1492_v2 = vmax.f32 %v1490_v10, %v1491_v39 }
 0x250   :  { %v1115_v57 = vmax.f32 %v1032_v49, 0.0  ;;  %v1152_v62 = vpack.c.bf16 %v1114_v34, %v1112_v59 }
 0x251   :  { %v1495_v42 = vmax.f32 %v1458_v28, %v1459_v56  ;;  %v1493_v30 = vrot.slane %v1492_v2, 1 }
 0x252   :  { %v1153_v60 = vpack.c.bf16 %v1115_v57, %v1113_v36 }
 0x253   :  { %v1496_v61 = vrot.slane %v1495_v42, 4  ;;  %v1494_v17 = vmax.f32 %v1492_v2, %v1493_v30 }
 0x254   :  { %1423 = vmatprep.mubr.bf16.mxu1 %v1153_v60 }
 0x255   :  { %v1497_v0 = vmax.f32 %v1495_v42, %v1496_v61  ;;  %1424 = vmatmul.mubr.bf16.gmra.mxu1 %v1152_v62  ;;  %v1600_v12 = vpack.c.bf16 %v1494_v17, %v1494_v17 }
 0x257   :  { %v1498_v6 = vrot.slane %v1497_v0, 2  ;;  %v2201_v4 = vpop.f32.mrf.mxu1  ;;  %v1648_v20 = vunpack.c.l.b16 %v1600_v12 }
 0x259   :  { %v1499_v7 = vmax.f32 %v1497_v0, %v1498_v6  ;;  %v2202_v13 = vpop.f32.mrf.mxu1 }
 0x25a   :  { %v2203_v63 = vadd.f32 %v2202_v13, %v2201_v4  ;;  %v1035_v33 = vpop.f32.mrf.mxu0 }
 0x25b   :  { %v1500_v52 = vrot.slane %v1499_v7, 1  ;;  %v2204_v9 = vpop.f32.mrf.mxu1  ;;  %v1036_v18 = vadd.f32 %v1035_v33, %v3051_v44 }
 0x25c   :  { %v1037_v11 = vpop.f32.mrf.mxu0  ;;  %v1346_v5 = vadd.f32 %v2203_v63, %v3145_v15 }
 0x25d   :  { %v1501_v8 = vmax.f32 %v1499_v7, %v1500_v52  ;;  %v2205_v50 = vpop.f32.mrf.mxu1  ;;  %v1038_v53 = vadd.f32 %v1037_v11, %v3048_v1  ;;  %v1116_v58 = vmax.f32 %v1036_v18, 0.0 }
 0x25e   :  { %v2206_v14 = vadd.f32 %v2205_v50, %v2204_v9  ;;  %v1039_v38 = vpop.f32.mrf.mxu0  ;;  %v1460_v21 = vmax.f32 %v1346_v5, 0.0 }
 0x25f   :  { %v1601_v16 = vpack.c.bf16 %v1501_v8, %v1501_v8  ;;  %v1040_v31 = vadd.f32 %v1039_v38, %v3051_v44  ;;  %v1117_v23 = vmax.f32 %v1038_v53, 0.0  ;;  %v2407_v38 = vld [vmem:[%s3332_s7 + $0x70] ss:$8 sps:$4 sm:$0xff]  }
 0x260   :  { %v1349_v54 = vadd.f32 %v2206_v14, %v3145_v15  ;;  %v1041_v19 = vpop.f32.mrf.mxu0 }
 0x261   :  { %v1649_v35 = vunpack.c.l.b16 %v1601_v16  ;;  %v1042_v51 = vadd.f32 %v1041_v19, %v3048_v1  ;;  %v1118_v22 = vmax.f32 %v1040_v31, 0.0  ;;  %v2409_v16 = vld [vmem:[%s3332_s7 + $0x74] ss:$8 sps:$4 sm:$0xff]  }
 0x262   :  { %v1461_v29 = vmax.f32 %v1349_v54, 0.0  ;;  %1767 = vmatprep.subr.bf16.mxu0 %v2409_v16  ;;  %v2415_v16 = vld [vmem:[%s3332_s7 + $0x54] ss:$8 sps:$4 sm:$0xff]  }
 0x263   :  { %v1665_v55 = vsel %vm1664_vm1, %v1649_v35, %v1648_v20  ;;  %v1119_v24 = vmax.f32 %v1042_v51, 0.0  ;;  %v1154_v10 = vpack.c.bf16 %v1118_v22, %v1116_v58  ;;  %1768 = vmatpush1.bf16.msra.mxu0 %v2407_v38  ;;  %v2413_v38 = vld [vmem:[%s3332_s7 + $0x50] ss:$8 sps:$4 sm:$0xff]  }
 0x264   :  { %v1502_v37 = vmax.f32 %v1460_v21, %v1461_v29 }
 0x265   :  { %v1155_v25 = vpack.c.bf16 %v1119_v24, %v1117_v23 }
 0x266   :  { %v1503_v26 = vrot.slane %v1502_v37, 4 }
 0x267   :  { %1431 = vmatprep.mubr.bf16.mxu1 %v1155_v25 }
 0x268   :  { %v1504_v32 = vmax.f32 %v1502_v37, %v1503_v26  ;;  %1432 = vmatmul.mubr.bf16.gmra.mxu1 %v1154_v10 }
 0x26a   :  { %v1505_v27 = vrot.slane %v1504_v32, 2  ;;  %v2207_v41 = vpop.f32.mrf.mxu1 }
 0x26c   :  { %v1506_v45 = vmax.f32 %v1504_v32, %v1505_v27  ;;  %v2208_v48 = vpop.f32.mrf.mxu1 }
 0x26d   :  { %v2209_v39 = vadd.f32 %v2208_v48, %v2207_v41  ;;  %v1045_v49 = vpop.f32.mrf.mxu0 }
 0x26e   :  { %v1507_v28 = vrot.slane %v1506_v45, 1  ;;  %v2210_v56 = vpop.f32.mrf.mxu1  ;;  %v1046_v30 = vadd.f32 %v1045_v49, %v3051_v44 }
 0x26f   :  { %v1047_v34 = vpop.f32.mrf.mxu0  ;;  %v1354_v2 = vadd.f32 %v2209_v39, %v3145_v15 }
 0x270   :  { %v1508_v36 = vmax.f32 %v1506_v45, %v1507_v28  ;;  %v2211_v57 = vpop.f32.mrf.mxu1  ;;  %v1048_v61 = vadd.f32 %v1047_v34, %v3048_v1  ;;  %v1120_v11 = vmax.f32 %v1046_v30, 0.0 }
 0x271   :  { %v2212_v59 = vadd.f32 %v2211_v57, %v2210_v56  ;;  %v1049_v42 = vpop.f32.mrf.mxu0  ;;  %v1462_v7 = vmax.f32 %v1354_v2, 0.0 }
 0x272   :  { %v1602_v60 = vpack.c.bf16 %v1508_v36, %v1508_v36  ;;  %v1050_v62 = vadd.f32 %v1049_v42, %v3051_v44  ;;  %v1121_v52 = vmax.f32 %v1048_v61, 0.0  ;;  %v2410_v42 = vld [vmem:[%s3332_s7 + $0x60] ss:$8 sps:$4 sm:$0xff]  }
 0x273   :  { %v1357_v0 = vadd.f32 %v2212_v59, %v3145_v15  ;;  %v1051_v6 = vpop.f32.mrf.mxu0 }
 0x274   :  { %v1650_v4 = vunpack.c.l.b16 %v1602_v60  ;;  %v1052_v17 = vadd.f32 %v1051_v6, %v3048_v1  ;;  %v1122_v63 = vmax.f32 %v1050_v62, 0.0 }
 0x275   :  { %v1463_v13 = vmax.f32 %v1357_v0, 0.0 }
 0x276   :  { %v1667_v33 = vsel %vm1666_vm2, %v1650_v4, %v1665_v55  ;;  %v1123_v9 = vmax.f32 %v1052_v17, 0.0  ;;  %v1156_v5 = vpack.c.bf16 %v1122_v63, %v1120_v11 }
 0x277   :  { %v1509_v12 = vmax.f32 %v1462_v7, %v1463_v13 }
 0x278   :  { %v1157_v8 = vpack.c.bf16 %v1123_v9, %v1121_v52 }
 0x279   :  { %v1510_v50 = vrot.slane %v1509_v12, 4 }
 0x27a   :  { %1439 = vmatprep.mubr.bf16.mxu1 %v1157_v8 }
 0x27b   :  { %v1511_v14 = vmax.f32 %v1509_v12, %v1510_v50  ;;  %1440 = vmatmul.mubr.bf16.gmra.mxu1 %v1156_v5 }
 0x27d   :  { %v1512_v53 = vrot.slane %v1511_v14, 2  ;;  %v2213_v31 = vpop.f32.mrf.mxu1 }
 0x27f   :  { %v1513_v18 = vmax.f32 %v1511_v14, %v1512_v53  ;;  %v2214_v54 = vpop.f32.mrf.mxu1 }
 0x280   :  { %v2215_v19 = vadd.f32 %v2214_v54, %v2213_v31  ;;  %v1055_v20 = vpop.f32.mrf.mxu0 }
 0x281   :  { %v1514_v35 = vrot.slane %v1513_v18, 1  ;;  %v2216_v51 = vpop.f32.mrf.mxu1  ;;  %v1056_v26 = vadd.f32 %v1055_v20, %v3051_v44 }
 0x282   :  { %v1057_v21 = vpop.f32.mrf.mxu0  ;;  %v1362_v55 = vadd.f32 %v2215_v19, %v3145_v15 }
 0x283   :  { %v1515_v29 = vmax.f32 %v1513_v18, %v1514_v35  ;;  %v2217_v22 = vpop.f32.mrf.mxu1  ;;  %v1058_v37 = vadd.f32 %v1057_v21, %v3048_v1  ;;  %v1124_v34 = vmax.f32 %v1056_v26, 0.0 }
 0x284   :  { %v2218_v23 = vadd.f32 %v2217_v22, %v2216_v51  ;;  %v1059_v24 = vpop.f32.mrf.mxu0  ;;  %v1464_v45 = vmax.f32 %v1362_v55, 0.0 }
 0x285   :  { %v1603_v58 = vpack.c.bf16 %v1515_v29, %v1515_v29  ;;  %v1060_v25 = vadd.f32 %v1059_v24, %v3051_v44  ;;  %v1125_v28 = vmax.f32 %v1058_v37, 0.0 }
 0x286   :  { %v1365_v10 = vadd.f32 %v2218_v23, %v3145_v15  ;;  %v1061_v32 = vpop.f32.mrf.mxu0 }
 0x287   :  { %v1651_v27 = vunpack.c.l.b16 %v1603_v58  ;;  %v1062_v41 = vadd.f32 %v1061_v32, %v3048_v1  ;;  %v1126_v39 = vmax.f32 %v1060_v25, 0.0  ;;  %v2412_v1 = vld [vmem:[%s3332_s7 + $0x64] ss:$8 sps:$4 sm:$0xff]  }
 0x288   :  { %v1465_v48 = vmax.f32 %v1365_v10, 0.0  ;;  %1769 = vmatprep.subr.bf16.mxu0 %v2412_v1 }
 0x289   :  { %v1669_v49 = vsel %vm1668_vm3, %v1651_v27, %v1667_v33  ;;  %v1127_v56 = vmax.f32 %v1062_v41, 0.0  ;;  %v1158_v59 = vpack.c.bf16 %v1126_v39, %v1124_v34  ;;  %1770 = vmatpush1.bf16.msra.mxu0 %v2410_v42  ;;  %v2416_v27 = vld [vmem:[%s3332_s7 + $0x40] ss:$8 sps:$4 sm:$0xff]   ;;  %v2418_v41 = vld [vmem:[%s3332_s7 + $0x44] ss:$8 sps:$4 sm:$0xff]  }
 0x28a   :  { %v1516_v36 = vmax.f32 %v1464_v45, %v1465_v48  ;;  %1771 = vmatprep.subr.bf16.mxu0 %v2415_v16  ;;  %v2430_v16 = vld [vmem:[%s3332_s7 + $0x4] ss:$8 sps:$4 sm:$0xff]  }
 0x28b   :  { %v1159_v57 = vpack.c.bf16 %v1127_v56, %v1125_v28 }
 0x28c   :  { %v1517_v2 = vrot.slane %v1516_v36, 4 }
 0x28d   :  { %1447 = vmatprep.mubr.bf16.mxu1 %v1159_v57  ;;  %1772 = vmatpush1.bf16.msra.mxu0 %v2413_v38 }
 0x28e   :  { %v1518_v44 = vmax.f32 %v1516_v36, %v1517_v2  ;;  %1448 = vmatmul.mubr.bf16.gmra.mxu1 %v1158_v59  ;;  %1773 = vmatprep.subr.bf16.mxu0 %v2418_v41 }
 0x290   :  { %v1519_v60 = vrot.slane %v1518_v44, 2  ;;  %v2219_v61 = vpop.f32.mrf.mxu1 }
 0x291   :  { %1774 = vmatpush1.bf16.msra.mxu0 %v2416_v27 }
 0x292   :  { %v1520_v62 = vmax.f32 %v1518_v44, %v1519_v60  ;;  %v2220_v30 = vpop.f32.mrf.mxu1 }
 0x293   :  { %v2221_v0 = vadd.f32 %v2220_v30, %v2219_v61 }
 0x294   :  { %v1521_v6 = vrot.slane %v1520_v62, 1  ;;  %v2222_v4 = vpop.f32.mrf.mxu1 }
 0x295   :  { %v1370_v13 = vadd.f32 %v2221_v0, %v3145_v15 }
 0x296   :  { %v1522_v17 = vmax.f32 %v1520_v62, %v1521_v6  ;;  %v2223_v7 = vpop.f32.mrf.mxu1 }
 0x297   :  { %v2224_v63 = vadd.f32 %v2223_v7, %v2222_v4  ;;  %v1466_v11 = vmax.f32 %v1370_v13, 0.0  ;;  %v2419_v4 = vld [vmem:[%s3332_s7 + $0x30] ss:$8 sps:$4 sm:$0xff]   ;;  %v2424_v7 = vld [vmem:[%s3332_s7 + $0x24] ss:$8 sps:$4 sm:$0xff]  }
 0x298   :  { %v1604_v33 = vpack.c.bf16 %v1522_v17, %v1522_v17  ;;  %v2421_v17 = vld [vmem:[%s3332_s7 + $0x34] ss:$8 sps:$4 sm:$0xff]  }
 0x299   :  { %v1373_v52 = vadd.f32 %v2224_v63, %v3145_v15  ;;  %1775 = vmatprep.subr.bf16.mxu0 %v2421_v17  ;;  %v2422_v63 = vld [vmem:[%s3332_s7 + $0x20] ss:$8 sps:$4 sm:$0xff]  }
 0x29a   :  { %v1652_v9 = vunpack.c.l.b16 %v1604_v33  ;;  %1776 = vmatpush1.bf16.msra.mxu0 %v2419_v4 }
 0x29b   :  { %v1467_v12 = vmax.f32 %v1373_v52, 0.0  ;;  %1777 = vmatprep.subr.bf16.mxu0 %v2424_v7 }
 0x29c   :  { %v1671_v8 = vsel %vm1670_vm4, %v1652_v9, %v1669_v49 }
 0x29d   :  { %v1523_v50 = vmax.f32 %v1466_v11, %v1467_v12 }
 0x29e   :  { %1778 = vmatpush1.bf16.msra.mxu0 %v2422_v63 }
 0x29f   :  { %v1524_v5 = vrot.slane %v1523_v50, 4 }
 0x2a1   :  { %v1525_v14 = vmax.f32 %v1523_v50, %v1524_v5  ;;  %v2425_v50 = vld [vmem:[%s3332_s7 + $0x10] ss:$8 sps:$4 sm:$0xff]   ;;  %v2427_v5 = vld [vmem:[%s3332_s7 + $0x14] ss:$8 sps:$4 sm:$0xff]  }
 0x2a2   :  { %1779 = vmatprep.subr.bf16.mxu0 %v2427_v5 }
 0x2a3   :  { %v1526_v53 = vrot.slane %v1525_v14, 2  ;;  %v2225_v31 = vpop.f32.mrf.mxu1  ;;  %1780 = vmatpush1.bf16.msra.mxu0 %v2425_v50 }
 0x2a4   :  { %1781 = vmatprep.subr.bf16.mxu0 %v2430_v16 }
 0x2a5   :  { %v1527_v18 = vmax.f32 %v1525_v14, %v1526_v53  ;;  %v2226_v54 = vpop.f32.mrf.mxu1  ;;  %v2428_v53 = vld [vmem:[%s3332_s7] ss:$8 sps:$4 sm:$0xff]  }
 0x2a6   :  { %v2227_v19 = vadd.f32 %v2226_v54, %v2225_v31  ;;  %v2494_v54 = vmov 0.0  }
 0x2a7   :  { %v1528_v20 = vrot.slane %v1527_v18, 1  ;;  %v2228_v35 = vpop.f32.mrf.mxu1  ;;  %1782 = vmatpush1.bf16.msra.mxu0 %v2428_v53  ;;  %2294 = vmatprep.subr.bf16.mxu1 %v2494_v54 }
 0x2a8   :  { %v1378_v29 = vadd.f32 %v2227_v19, %v3145_v15  ;;  %2310 = vmatprep.mubr.msk.bf16.mxu1 %vm2495_vm8, %v2494_v54 }
 0x2a9   :  { %v1529_v51 = vmax.f32 %v1527_v18, %v1528_v20  ;;  %v2229_v21 = vpop.f32.mrf.mxu1  ;;  %v2431_v18 = vld [vmem:[%s3334_s9 + $0x38] sm:$0xff]   ;;  %v2432_v20 = vld [vmem:[%s3334_s9 + $0x30] sm:$0xff]  }
 0x2aa   :  { %v2230_v22 = vadd.f32 %v2229_v21, %v2228_v35  ;;  %v1468_v58 = vmax.f32 %v1378_v29, 0.0  ;;  %2295 = vmatpush3.bf16.msra.mxu1 %v2431_v18  ;;  %v2434_v29 = vld [vmem:[%s3334_s9 + $0x20] sm:$0xff]  }
 0x2ab   :  { %v1605_v55 = vpack.c.bf16 %v1529_v51, %v1529_v51  ;;  %2296 = vmatprep.subr.bf16.mxu1 %v2494_v54  ;;  %v2433_v51 = vld [vmem:[%s3334_s9 + $0x28] sm:$0xff]  }
 0x2ac   :  { %v1381_v23 = vadd.f32 %v2230_v22, %v3145_v15 }
 0x2ad   :  { %v1653_v24 = vunpack.c.l.b16 %v1605_v55  ;;  %v2435_v55 = vld [vmem:[%s3334_s9 + $0x18] sm:$0xff]  }
 0x2ae   :  { %v1469_v37 = vmax.f32 %v1381_v23, 0.0  ;;  %2297 = vmatpush3.bf16.msra.mxu1 %v2432_v20 }
 0x2af   :  { %v1673_v25 = vsel %vm1672_vm5, %v1653_v24, %v1671_v8  ;;  %2298 = vmatprep.subr.bf16.mxu1 %v2494_v54 }
 0x2b0   :  { %v1530_v26 = vmax.f32 %v1468_v58, %v1469_v37  ;;  %v2436_v58 = vld [vmem:[%s3334_s9 + $0x10] sm:$0xff]  }
 0x2b2   :  { %v1531_v10 = vrot.slane %v1530_v26, 4  ;;  %2299 = vmatpush3.bf16.msra.mxu1 %v2433_v51 }
 0x2b3   :  { %2300 = vmatprep.subr.bf16.mxu1 %v2494_v54 }
 0x2b4   :  { %v1532_v32 = vmax.f32 %v1530_v26, %v1531_v10 }
 0x2b6   :  { %v1533_v45 = vrot.slane %v1532_v32, 2  ;;  %v2231_v48 = vpop.f32.mrf.mxu1  ;;  %2301 = vmatpush3.bf16.msra.mxu1 %v2434_v29 }
 0x2b7   :  { %2302 = vmatprep.subr.bf16.mxu1 %v2494_v54 }
 0x2b8   :  { %v1534_v39 = vmax.f32 %v1532_v32, %v1533_v45  ;;  %v2232_v49 = vpop.f32.mrf.mxu1 }
 0x2b9   :  { %v2233_v28 = vadd.f32 %v2232_v49, %v2231_v48 }
 0x2ba   :  { %v1535_v56 = vrot.slane %v1534_v39, 1  ;;  %v2234_v34 = vpop.f32.mrf.mxu1  ;;  %2303 = vmatpush3.bf16.msra.mxu1 %v2435_v55 }
 0x2bb   :  { %v1386_v2 = vadd.f32 %v2233_v28, %v3145_v15  ;;  %2304 = vmatprep.subr.bf16.mxu1 %v2494_v54 }
 0x2bc   :  { %v1536_v36 = vmax.f32 %v1534_v39, %v1535_v56  ;;  %v2235_v57 = vpop.f32.mrf.mxu1 }
 0x2bd   :  { %v2236_v59 = vadd.f32 %v2235_v57, %v2234_v34  ;;  %v1470_v60 = vmax.f32 %v1386_v2, 0.0 }
 0x2be   :  { %v1606_v44 = vpack.c.bf16 %v1536_v36, %v1536_v36  ;;  %2305 = vmatpush3.bf16.msra.mxu1 %v2436_v58 }
 0x2bf   :  { %v1389_v42 = vadd.f32 %v2236_v59, %v3145_v15  ;;  %2306 = vmatprep.subr.bf16.mxu1 %v2494_v54 }
 0x2c0   :  { %v1654_v1 = vunpack.c.l.b16 %v1606_v44 }
 0x2c1   :  { %v1471_v61 = vmax.f32 %v1389_v42, 0.0 }
 0x2c2   :  { %v1675_v62 = vsel %vm1674_vm6, %v1654_v1, %v1673_v25  ;;  %v2437_v25 = vld [vmem:[%s3334_s9 + $0x8] sm:$0xff]  }
 0x2c3   :  { %v1537_v30 = vmax.f32 %v1470_v60, %v1471_v61  ;;  %2307 = vmatpush3.bf16.msra.mxu1 %v2437_v25 }
 0x2c4   :  { %2308 = vmatprep.subr.bf16.mxu1 %v2494_v54  ;;  %v2163_v54 = vld [vmem:[%s3333_s8] ss:$0 sm:$0xff]  ;;  %s2496_s8 = smov [#allocation6]  }
 0x2c5   :  { %v1538_v0 = vrot.slane %v1537_v30, 4  ;;  %s2096_s24 = sshll.u32 %s2496_s8, 4  ;;  %s2097_s24 = int_to_ptr.vmem [resolvable:$true] %s2096_s24 }
 0x2c6   :  { %s2466_s10 = scalar_lea.vmem %s2097_s24, 16  ;;  %s2470_s5 = scalar_lea.vmem %s2097_s24, 32 }
 0x2c7   :  { %v1539_v6 = vmax.f32 %v1537_v30, %v1538_v0  ;;  %p2467_p5 = scmp.ne.s32.totalorder %s2097_s24, %s2466_s10  ;;  %p2471_p6 = scmp.lt.s32.totalorder %s2097_s24, %s2097_s24 }
 0x2c8   :  { %p2472_p7 = scmp.lt.s32.totalorder %s2470_s5, %s2466_s10 }
 0x2c9   :  { %v1540_v13 = vrot.slane %v1539_v6, 2  ;;  %v2237_v14 = vpop.f32.mrf.mxu1 }
 0x2ca   :  { %p2473_p8 = por %p2472_p7, %p2471_p6 }
 0x2cb   :  { %v1541_v33 = vmax.f32 %v1539_v6, %v1540_v13  ;;  %v2238_v38 = vpop.f32.mrf.mxu1 }
 0x2cc   :  { %p2474_p9 = pnand %p2473_p8, %p2467_p5 }
 0x2cd   :  { %v1542_v52 = vrot.slane %v1541_v33, 1  ;;  %v2240_v31 = vpop.f32.mrf.mxu1 }
 0x2cf   :  { %v1543_v9 = vmax.f32 %v1541_v33, %v1542_v52  ;;  %v2241_v19 = vpop.f32.mrf.mxu1 }
 0x2d0   :  { %v2242_v44 = vadd.f32 %v2241_v19, %v2240_v31 }
 0x2d1   :  { %v1607_v11 = vpack.c.bf16 %v1543_v9, %v1543_v9 }
 0x2d2   :  { %v1397_v13 = vadd.f32 %v2242_v44, %v3145_v15 }
 0x2d3   :  { %v1655_v12 = vunpack.c.l.b16 %v1607_v11 }
 0x2d4   :  { %v1473_v19 = vmax.f32 %v1397_v13, 0.0 }
 0x2d5   :  { %v3222_v8 = vsel %vm1676_vm7, %v1655_v12, %v1675_v62  ;;  %v2239_v62 = vadd.f32 %v2238_v38, %v2237_v14 }
 0x2d7   :  { %v1394_v5 = vadd.f32 %v2239_v62, %v3145_v15 }
 0x2dc   :  { %v2243_v35 = vpop.f32.mrf.mxu1 }
 0x2de   :  { %v2244_v21 = vpop.f32.mrf.mxu1 }
 0x2df   :  { %v2245_v42 = vadd.f32 %v2244_v21, %v2243_v35 }
 0x2e0   :  { %v2246_v22 = vpop.f32.mrf.mxu1 }
 0x2e1   :  { %v1402_v63 = vadd.f32 %v2245_v42, %v3145_v15 }
 0x2e2   :  { %v2247_v23 = vpop.f32.mrf.mxu1 }
 0x2e3   :  { %v2248_v57 = vadd.f32 %v2247_v23, %v2246_v22  ;;  %v1474_v20 = vmax.f32 %v1402_v63, 0.0 }
 0x2e5   :  { %v1405_v30 = vadd.f32 %v2248_v57, %v3145_v15 }
 0x2e7   :  { %v1475_v14 = vmax.f32 %v1405_v30, 0.0 }
 0x2e9   :  { %v1551_v58 = vmax.f32 %v1474_v20, %v1475_v14 }
 0x2ef   :  { %v2249_v24 = vpop.f32.mrf.mxu1 }
 0x2f1   :  { %v2250_v37 = vpop.f32.mrf.mxu1 }
 0x2f2   :  { %v2251_v60 = vadd.f32 %v2250_v37, %v2249_v24  ;;  %v1472_v24 = vmax.f32 %v1394_v5, 0.0 }
 0x2f3   :  { %v2252_v26 = vpop.f32.mrf.mxu1 }
 0x2f4   :  { %v1410_v11 = vadd.f32 %v2251_v60, %v3145_v15 }
 0x2f5   :  { %v2253_v10 = vpop.f32.mrf.mxu1 }
 0x2f6   :  { %v2254_v2 = vadd.f32 %v2253_v10, %v2252_v26  ;;  %v1476_v29 = vmax.f32 %v1410_v11, 0.0 }
 0x2f8   :  { %v1413_v17 = vadd.f32 %v2254_v2, %v3145_v15 }
 0x2fa   :  { %v1477_v31 = vmax.f32 %v1413_v17, 0.0 }
 0x2fc   :  { %v1558_v26 = vmax.f32 %v1476_v29, %v1477_v31 }
 0x302   :  { %v2255_v32 = vpop.f32.mrf.mxu1 }
 0x304   :  { %v2256_v27 = vpop.f32.mrf.mxu1 }
 0x305   :  { %v2257_v0 = vadd.f32 %v2256_v27, %v2255_v32  ;;  %v1544_v27 = vmax.f32 %v1472_v24, %v1473_v19 }
 0x306   :  { %v2258_v41 = vpop.f32.mrf.mxu1 }
 0x307   :  { %v1418_v38 = vadd.f32 %v2257_v0, %v3145_v15  ;;  %v1545_v57 = vrot.slane %v1544_v27, 4 }
 0x308   :  { %v2259_v45 = vpop.f32.mrf.mxu1 }
 0x309   :  { %v2260_v1 = vadd.f32 %v2259_v45, %v2258_v41  ;;  %v1478_v37 = vmax.f32 %v1418_v38, 0.0 }
 0x30b   :  { %v1421_v33 = vadd.f32 %v2260_v1, %v3145_v15 }
 0x30d   :  { %v1479_v35 = vmax.f32 %v1421_v33, 0.0 }
 0x30f   :  { %v1565_v41 = vmax.f32 %v1478_v37, %v1479_v35 }
 0x311   :  { %v1566_v2 = vrot.slane %v1565_v41, 4 }
 0x313   :  { %v1567_v62 = vmax.f32 %v1565_v41, %v1566_v2 }
 0x315   :  { %v2261_v48 = vpop.f32.mrf.mxu1  ;;  %v1568_v33 = vrot.slane %v1567_v62, 2 }
 0x317   :  { %v2262_v39 = vpop.f32.mrf.mxu1 }
 0x318   :  { %v2263_v7 = vadd.f32 %v2262_v39, %v2261_v48 }
 0x319   :  { %v2264_v49 = vpop.f32.mrf.mxu1 }
 0x31a   :  { %v1426_v18 = vadd.f32 %v2263_v7, %v3145_v15 }
 0x31b   :  { %v2265_v28 = vpop.f32.mrf.mxu1 }
 0x31c   :  { %v2266_v61 = vadd.f32 %v2265_v28, %v2264_v49  ;;  %v1480_v10 = vmax.f32 %v1426_v18, 0.0  ;;  %v1552_v28 = vrot.slane %v1551_v58, 4 }
 0x31e   :  { %v1429_v12 = vadd.f32 %v2266_v61, %v3145_v15  ;;  %v1553_v44 = vmax.f32 %v1551_v58, %v1552_v28  ;;  %v1546_v61 = vmax.f32 %v1544_v27, %v1545_v57 }
 0x320   :  { %v1481_v22 = vmax.f32 %v1429_v12, 0.0  ;;  %v1547_v63 = vrot.slane %v1546_v61, 2 }
 0x322   :  { %v1572_v48 = vmax.f32 %v1480_v10, %v1481_v22 }
 0x328   :  { %v2267_v56 = vpop.f32.mrf.mxu1 }
 0x32a   :  { %v2268_v34 = vpop.f32.mrf.mxu1 }
 0x32b   :  { %v2269_v52 = vadd.f32 %v2268_v34, %v2267_v56  ;;  %v1559_v34 = vrot.slane %v1558_v26, 4 }
 0x32c   :  { %v2270_v36 = vpop.f32.mrf.mxu1 }
 0x32d   :  { %v1434_v51 = vadd.f32 %v2269_v52, %v3145_v15  ;;  %v1560_v1 = vmax.f32 %v1558_v26, %v1559_v34 }
 0x32e   :  { %v2271_v59 = vpop.f32.mrf.mxu1 }
 0x32f   :  { %v2272_v6 = vadd.f32 %v2271_v59, %v2270_v36  ;;  %v1482_v45 = vmax.f32 %v1434_v51, 0.0  ;;  %v1573_v59 = vrot.slane %v1572_v48, 4  ;;  %v1561_v17 = vrot.slane %v1560_v1, 2 }
 0x331   :  { %v1437_v16 = vadd.f32 %v2272_v6, %v3145_v15  ;;  %v1574_v30 = vmax.f32 %v1572_v48, %v1573_v59  ;;  %v1554_v6 = vrot.slane %v1553_v44, 2  ;;  %v1562_v5 = vmax.f32 %v1560_v1, %v1561_v17 }
 0x333   :  { %v1483_v25 = vmax.f32 %v1437_v16, 0.0  ;;  %v1555_v12 = vmax.f32 %v1553_v44, %v1554_v6  ;;  %v1548_v16 = vmax.f32 %v1546_v61, %v1547_v63 }
 0x335   :  { %v1579_v56 = vmax.f32 %v1482_v45, %v1483_v25  ;;  %v1556_v20 = vrot.slane %v1555_v12, 1  ;;  %v1549_v22 = vrot.slane %v1548_v16, 1 }
 0x337   :  { %v1580_v42 = vrot.slane %v1579_v56, 4  ;;  %v1557_v37 = vmax.f32 %v1555_v12, %v1556_v20  ;;  %v1550_v27 = vmax.f32 %v1548_v16, %v1549_v22 }
 0x339   :  { %v1608_v34 = vpack.c.bf16 %v1550_v27, %v1550_v27 }
 0x33b   :  { %v2273_v4 = vpop.f32.mrf.mxu1  ;;  %v1656_v61 = vunpack.c.l.b16 %v1608_v34 }
 0x33d   :  { %v2274_v9 = vpop.f32.mrf.mxu1 }
 0x33e   :  { %v2275_v50 = vadd.f32 %v2274_v9, %v2273_v4  ;;  %v1581_v4 = vmax.f32 %v1579_v56, %v1580_v42  ;;  %v1575_v9 = vrot.slane %v1574_v30, 2 }
 0x33f   :  { %v2276_v53 = vpop.f32.mrf.mxu1 }
 0x340   :  { %v1442_v55 = vadd.f32 %v2275_v50, %v3145_v15  ;;  %v1582_v50 = vrot.slane %v1581_v4, 2  ;;  %v1576_v19 = vmax.f32 %v1574_v30, %v1575_v9 }
 0x341   :  { %v2277_v21 = vpop.f32.mrf.mxu1 }
 0x342   :  { %v2278_v23 = vadd.f32 %v2277_v21, %v2276_v53  ;;  %v1484_v39 = vmax.f32 %v1442_v55, 0.0  ;;  %v1569_v53 = vmax.f32 %v1567_v62, %v1568_v33  ;;  %v1583_v35 = vmax.f32 %v1581_v4, %v1582_v50 }
 0x343   :  { %v1563_v21 = vrot.slane %v1562_v5, 1  ;;  %v1577_v58 = vrot.slane %v1576_v19, 1 }
 0x344   :  { %v1445_v32 = vadd.f32 %v2278_v23, %v3145_v15  ;;  %v1570_v55 = vrot.slane %v1569_v53, 1  ;;  %v1584_v25 = vrot.slane %v1583_v35, 1 }
 0x345   :  { %v1564_v10 = vmax.f32 %v1562_v5, %v1563_v21  ;;  %v1578_v48 = vmax.f32 %v1576_v19, %v1577_v58 }
 0x346   :  { %v1485_v49 = vmax.f32 %v1445_v32, 0.0  ;;  %v1571_v41 = vmax.f32 %v1569_v53, %v1570_v55 }
 0x347   :  { %v1612_v2 = vpack.c.bf16 %v1578_v48, %v1578_v48 }
 0x348   :  { %v1586_v36 = vmax.f32 %v1484_v39, %v1485_v49  ;;  %v1609_v39 = vpack.c.bf16 %v1557_v37, %v1557_v37  ;;  %v1585_v49 = vmax.f32 %v1583_v35, %v1584_v25 }
 0x34a   :  { %v1587_v60 = vrot.slane %v1586_v36, 4  ;;  %v1657_v59 = vunpack.c.l.b16 %v1609_v39  ;;  %v1613_v44 = vpack.c.bf16 %v1585_v49, %v1585_v49 }
 0x34c   :  { %v1588_v7 = vmax.f32 %v1586_v36, %v1587_v60  ;;  %v1611_v36 = vpack.c.bf16 %v1571_v41, %v1571_v41  ;;  %v1678_v6 = vsel %vm1664_vm1, %v1657_v59, %v1656_v61  ;;  %v1661_v4 = vunpack.c.l.b16 %v1613_v44 }
 0x34e   :  { %v2279_v0 = vpop.f32.mrf.mxu1  ;;  %v1589_v14 = vrot.slane %v1588_v7, 2  ;;  %v1659_v62 = vunpack.c.l.b16 %v1611_v36 }
 0x350   :  { %v2280_v13 = vpop.f32.mrf.mxu1  ;;  %v1590_v29 = vmax.f32 %v1588_v7, %v1589_v14  ;;  %v2438_v14 = vld [vmem:[%s3334_s9] sm:$0xff]  }
 0x351   :  { %v2281_v52 = vadd.f32 %v2280_v13, %v2279_v0  ;;  %v1660_v0 = vunpack.c.l.b16 %v1612_v2  ;;  %2309 = vmatpush3.bf16.msra.mxu1 %v2438_v14 }
 0x352   :  { %v2282_v11 = vpop.f32.mrf.mxu1  ;;  %v1591_v32 = vrot.slane %v1590_v29, 1 }
 0x353   :  { %v1450_v31 = vadd.f32 %v2281_v52, %v3145_v15 }
 0x354   :  { %v2283_v38 = vpop.f32.mrf.mxu1  ;;  %v1592_v56 = vmax.f32 %v1590_v29, %v1591_v32 }
 0x355   :  { %v2284_v18 = vadd.f32 %v2283_v38, %v2282_v11  ;;  %v1486_v23 = vmax.f32 %v1450_v31, 0.0 }
 0x356   :  { %v1614_v60 = vpack.c.bf16 %v1592_v56, %v1592_v56  ;;  %v1953_v56 = vand.u32 127, %v247_v40 }
 0x357   :  { %v1453_v51 = vadd.f32 %v2284_v18, %v3145_v15  ;;  %v1610_v15 = vpack.c.bf16 %v1564_v10, %v1564_v10 }
 0x358   :  { %v1662_v13 = vunpack.c.l.b16 %v1614_v60  ;;  %v3300_v34 = vsub.s32 %v1953_v56, %v2745_v43 }
 0x359   :  { %v1487_v24 = vmax.f32 %v1453_v51, 0.0  ;;  %v1658_v1 = vunpack.c.l.b16 %v1610_v15  ;;  %v2172_v15 = vld [vmem:[#allocation2] ss:$0 sm:$0xff] }
 0x35b   :  { %v1593_v26 = vmax.f32 %v1486_v23, %v1487_v24  ;;  %v1679_v7 = vsel %vm1666_vm2, %v1658_v1, %v1678_v6 }
 0x35c   :  { %v1680_v63 = vsel %vm1668_vm3, %v1659_v62, %v1679_v7 }
 0x35d   :  { %v1594_v45 = vrot.slane %v1593_v26, 4  ;;  %v1681_v52 = vsel %vm1670_vm4, %v1660_v0, %v1680_v63 }
 0x35e   :  { %v1682_v9 = vsel %vm1672_vm5, %v1661_v4, %v1681_v52 }
 0x35f   :  { %v1595_v28 = vmax.f32 %v1593_v26, %v1594_v45  ;;  %v1683_v12 = vsel %vm1674_vm6, %v1662_v13, %v1682_v9 }
 0x361   :  { %v1596_v57 = vrot.slane %v1595_v28, 2 }
 0x363   :  { %v1597_v42 = vmax.f32 %v1595_v28, %v1596_v57 }
 0x365   :  { %v1598_v30 = vrot.slane %v1597_v42, 1 }
 0x367   :  { %v1599_v17 = vmax.f32 %v1597_v42, %v1598_v30 }
 0x369   :  { %v1615_v33 = vpack.c.bf16 %v1599_v17, %v1599_v17 }
 0x36b   :  { %v1663_v11 = vunpack.c.l.b16 %v1615_v33 }
 0x36d   :  { %v1684_v50 = vsel %vm1676_vm7, %v1663_v11, %v1683_v12 }
 0x36e   :  { %v1685_v5 = vpack.c.b16 %v1684_v50, %v3222_v8 }
 0x370   :  { %1800 = vmatmul.mubr.bf16.vlgmr.msra.gmra.mxu0 %v1685_v5 }
 0x430   :  { %v1801_v38 = vpop.f32.mrf.mxu0 }
 0x432   :  { %v1803_v16 = vpop.f32.mrf.mxu0 }
 0x433   :  { %v1810_v53 = vrot.slane %v1803_v16, 4 }
 0x434   :  { %v1805_v31 = vpop.f32.mrf.mxu0 }
 0x435   :  { %v1811_v18 = vadd.f32 %v1810_v53, %v1803_v16 }
 0x436   :  { %v1807_v19 = vpop.f32.mrf.mxu0 }
 0x437   :  { %v1812_v20 = vrot.slane %v1811_v18, 2  ;;  %v1816_v35 = vrot.slane %v1807_v19, 4 }
 0x439   :  { %v1813_v51 = vadd.f32 %v1812_v20, %v1811_v18  ;;  %v1817_v21 = vadd.f32 %v1816_v35, %v1807_v19 }
 0x43b   :  { %v1814_v8 = vrot.slane %v1813_v51, 1  ;;  %v1818_v29 = vrot.slane %v1817_v21, 2 }
 0x43d   :  { %v1815_v22 = vadd.f32 %v1814_v8, %v1813_v51  ;;  %v1819_v55 = vadd.f32 %v1818_v29, %v1817_v21 }
 0x43f   :  { %v1823_v23 = vmul.f32 0.125, %v1815_v22  ;;  %v1820_v24 = vrot.slane %v1819_v55, 1 }
 0x441   :  { %v1825_v58 = vadd.f32 %v1823_v23, %v1801_v38  ;;  %v1821_v37 = vadd.f32 %v1820_v24, %v1819_v55  ;;  %v2080_v24 = vadd.s32 4294967288, %v1953_v56 }
 0x443   :  { %v1824_v25 = vmul.f32 0.125, %v1821_v37  ;;  %v1834_v10 = vadd.f32 %v2163_v54, %v1825_v58  ;;  %v2083_v58 = vsub.s32 %v2080_v24, %v2745_v43 }
 0x445   :  { %v1826_v26 = vadd.f32 %v1824_v25, %v1805_v31  ;;  %v1836_v27 = vmax.f32 %v1834_v10, 0.0 }
 0x447   :  { %v1835_v32 = vadd.f32 %v2163_v54, %v1826_v26 }
 0x449   :  { %v1837_v41 = vmax.f32 %v1835_v32, 0.0 }
 0x44b   :  { %v1838_v45 = vpack.c.bf16 %v1837_v41, %v1836_v27 }
 0x44d   :  { %2311 = vmatmul.mubr.bf16.vlgmr.msra.gmra.mxu1 %v1838_v45 }
 0x50d   :  { %v1937_v48 = vpop.f32.mrf.mxu1 }
 0x50e   :  { %1947 = vperm.xlu1 %2375, %v1937_v48  }
 0x50f   :  { %v2312_v39 = vpop.f32.mrf.mxu1 }
 0x511   :  { %v1940_v49 = vpop.f32.mrf.mxu1 }
 0x512   :  { %1950 = vperm.xlu0 %2376, %v1940_v49   ;;  %2378 = vset.pattern.permute.xlu1 %v2493_v3 }
 0x513   :  { %v2313_v28 = vpop.f32.mrf.mxu1 }
 0x516   :  { %2377 = vset.pattern.permute.xlu0 %v2493_v3 }
 0x517   :  { %1989 = vperm.xlu0 %2377, %v2172_v15  }
 0x589   :  { %v1948_v36 = vpop.permute.xlu1 %1947 }
 0x58a   :  { %v1957_v2 = vrot.slane %v1948_v36, %v3300_v34 }
 0x58d   :  { %v1951_v57 = vpop.permute.xlu0 %1950 }
 0x58e   :  { %v1961_v59 = vrot.slane %v1951_v57, %v3300_v34 }
 0x590   :  { %v1962_v44 = vsel %vm1664_vm1, %v1961_v59, %v1957_v2 }
 0x591   :  { %v1965_v42 = vsel %vm1964_vm9, %v1962_v44, 0.0 }
 0x592   :  { %1966 = vadd.xlane.f32.xlu1 %v1965_v42  ;;  %v1990_v61 = vpop.permute.xlu0 %1989 }
 0x61b   :  { %v1967_v1 = vpop.xlane.xlu1 %1966 }
 0x61c   :  { %v1968_v3 = vmul.f32 0.125, %v1967_v1 }
 0x61e   :  { %v1973_v60 = vrot.slane %v1968_v3, %v2753_v47  ;;  %v1977_v40 = vrot.slane %v1968_v3, %v2750_v46 }
 0x620   :  { %v1980_v62 = vadd.f32 %v1973_v60, %v1937_v48  ;;  %v1981_v30 = vadd.f32 %v1977_v40, %v1940_v49 }
 0x622   :  { %v1992_v0 = vadd.f32 %v1990_v61, %v1980_v62  ;;  %v1993_v6 = vadd.f32 %v1990_v61, %v1981_v30 }
 0x624   :  { %1997 = vperm.xlu0 %2377, %v1992_v0  }
 0x628   :  { %2000 = vperm.xlu0 %2377, %v1993_v6  }
 0x69f   :  { %v1998_v4 = vpop.permute.xlu0 %1997 }
 0x6a0   :  { %v2005_v7 = vrot.slane %v1998_v4, %v3300_v34 }
 0x6a3   :  { %v2001_v17 = vpop.permute.xlu0 %2000 }
 0x6a4   :  { %v2009_v13 = vrot.slane %v2001_v17, %v3300_v34 }
 0x6a6   :  { %v2010_v63 = vsel %vm1664_vm1, %v2009_v13, %v2005_v7 }
 0x6a7   :  { %v2012_v33 = vsel %vm1964_vm9, %v2010_v63, -inf }
 0x6a8   :  { %2013 = vmax.xlane.f32.xlu0 %v2012_v33 }
 0x731   :  { %v2014_v52 = vpop.xlane.xlu0 %2013 }
 0x732   :  { %v2019_v9 = vrot.slane %v2014_v52, %v2753_v47  ;;  %v2023_v11 = vrot.slane %v2014_v52, %v2750_v46 }
 0x734   :  { %v2026_v12 = vsub.f32 %v1992_v0, %v2019_v9  ;;  %v2027_v50 = vsub.f32 %v1993_v6, %v2023_v11 }
 0x736   :  { %v2028_v5 = vmul.f32 1.442695, %v2026_v12  ;;  %v2030_v14 = vmul.f32 1.442695, %v2027_v50 }
 0x738   :  { %2439 = vpow2.f32 %v2028_v5 }
 0x739   :  { %2441 = vpow2.f32 %v2030_v14 }
 0x745   :  { %v2440_v38 = vpop.eup %2439 }
 0x746   :  { %2035 = vperm.xlu1 %2378, %v2440_v38   ;;  %v2442_v16 = vpop.eup %2441 }
 0x74a   :  { %2038 = vperm.xlu1 %2378, %v2442_v16  }
 0x7c1   :  { %v2036_v53 = vpop.permute.xlu1 %2035 }
 0x7c2   :  { %v2043_v18 = vrot.slane %v2036_v53, %v3300_v34 }
 0x7c5   :  { %v2039_v31 = vpop.permute.xlu1 %2038 }
 0x7c6   :  { %v2047_v19 = vrot.slane %v2039_v31, %v3300_v34 }
 0x7c8   :  { %v2048_v20 = vsel %vm1664_vm1, %v2047_v19, %v2043_v18 }
 0x7c9   :  { %v2050_v35 = vsel %vm1964_vm9, %v2048_v20, 0.0 }
 0x7ca   :  { %2051 = vadd.xlane.f32.xlu0 %v2050_v35 }
 0x853   :  { %v2052_v51 = vpop.xlane.xlu0 %2051 }
 0x854   :  { %2443 = vlog2.f32 %v2052_v51 }
 0x861   :  { %v2444_v21 = vpop.eup %2443 }
 0x862   :  { %v2054_v8 = vmul.f32 0.6931472, %v2444_v21 }
 0x864   :  { %v2059_v29 = vrot.slane %v2054_v8, %v2753_v47  ;;  %v2063_v22 = vrot.slane %v2054_v8, %v2750_v46 }
 0x866   :  { %v2067_v55 = vsub.f32 %v2027_v50, %v2063_v22  ;;  %v2066_v23 = vsub.f32 %v2026_v12, %v2059_v29 }
 0x868   :  { %2074 = vperm.xlu0 %2377, %v2067_v55   ;;  %2071 = vperm.xlu1 %2378, %v2066_v23  }
 0x8e3   :  { %v2075_v37 = vpop.permute.xlu0 %2074  ;;  %v2072_v54 = vpop.permute.xlu1 %2071 }
 0x8e4   :  { %v2084_v25 = vrot.slane %v2075_v37, %v2083_v58  ;;  %v2079_v26 = vrot.slane %v2072_v54, %v3300_v34 }
 0x8e6   :  { %v2086_v47 = vsel %vm2085_vm10, %v2084_v25, %v2079_v26 }
 0x8e7   :  { %2089 = vst.msk [vmem:[#allocation6] sm:$0x1] %vm2088_vm11, %v2086_v47 }
 0x8e8   :  { %2477 = shalt.err (!%p2474_p9)
}
 0x8e9   :  { %2099 = dma.vmem_to_hbm [thread:$0]  %s2097_s24, 16, %s3336_s11, [#allocation5]  }
 0x8ea   :  { %2488 = dma.done.wait [#allocation5], 16  }
 0x8eb   :  { %2489 = vsyncadd [#allocation5], 4294967280 }
 0x8ec   :  { %2103 = vsyncpa [#allocation4], 1 }
 0x8ed   :  { %2104 = vsyncpa [#allocation5], 1 }

</bundles_post_ra>
